<compile_context>
chip_gen: v6e
topology: v6e:2x2x1
jax: 0.10.0
libtpu: 0.0.40
codegen_flags: <defaults>
</compile_context>

<pallas_src>
import jax
import jax.numpy as jnp
from jax import lax
from jax.experimental import pallas as pl
from jax.experimental.pallas import tpu as pltpu

# ----------------------------- small test shapes -----------------------------
BATCH      = 2    # b
NUM_SEQ    = 3    # n (MSA rows)
SEQ_LEN    = 8    # l
EMBED_DIM  = 32   # d
NUM_HEADS  = 2    # h  -> head_dim = 16
EPS        = 1e-5  # nn.LayerNorm default


# -----------------------------------------------------------------------------
# Fused bidirectional cross-attention kernel (one group-tile per grid step).
# -----------------------------------------------------------------------------
def make_cross_attn_kernel(groups, seq_len, dim, heads, use_bf16_mxu=False):
    dh = dim // heads
    rows = groups * seq_len            # rows handled per grid step
    G = groups
    mxu_dtype = jnp.bfloat16 if use_bf16_mxu else jnp.float32

    def kernel(x1_ref, x2_ref, wqkv_ref, bqkv_ref, wo_ref, bo_ref,
               g_ref, beta_ref, out_ref):
        x1 = x1_ref[...]                                  # (rows, dim)  mat1 tile
        x2 = x2_ref[...]                                  # (rows, dim)  mat2 tile
        wqkv = wqkv_ref[...]
        bqkv = bqkv_ref[...]

        # --- fused QKV projection, two dots sharing one weight (no host concat)
        p1 = jnp.dot(x1.astype(mxu_dtype), wqkv,
                     preferred_element_type=jnp.float32) + bqkv   # (rows, 3*dim)
        p2 = jnp.dot(x2.astype(mxu_dtype), wqkv,
                     preferred_element_type=jnp.float32) + bqkv

        def split_heads(p, off):
            # (rows, 3*dim) -> list of H tensors (G, L, dh), head-major
            return [p[:, off + h * dh: off + (h + 1) * dh].reshape(G, seq_len, dh)
                    for h in range(heads)]

        q1 = split_heads(p1, 0);        q2 = split_heads(p2, 0)
        k1 = split_heads(p1, dim);      k2 = split_heads(p2, dim)
        v1 = split_heads(p1, 2 * dim);  v2 = split_heads(p2, 2 * dim)

        # --- one batched attention over (direction, head, group):
        #     batch order = [dir1_h0, dir1_h1, dir2_h0, dir2_h1] blocks of G.
        #     dir1: Q from mat1 / K,V from mat2 ; dir2: Q from mat2 / K,V from mat1
        q_all = jnp.concatenate(q1 + q2, axis=0)          # (2*H*G, L, dh)
        k_all = jnp.concatenate(k2 + k1, axis=0)
        v_all = jnp.concatenate(v2 + v1, axis=0)

        s = jnp.einsum('bqd,bkd->bqk',
                       q_all.astype(mxu_dtype), k_all.astype(mxu_dtype),
                       preferred_element_type=jnp.float32)        # (2HG, L, L)
        s = s - jnp.max(s, axis=-1, keepdims=True)
        p = jnp.exp(s)                                            # f32 (VPU/EUP)
        denom = jnp.sum(p, axis=-1, keepdims=True)
        ctx = jnp.einsum('bqk,bkd->bqd',
                         p.astype(mxu_dtype), v_all.astype(mxu_dtype),
                         preferred_element_type=jnp.float32)      # (2HG, L, dh)
        # normalize once post-AV: divide -> EUP reciprocal, fewer elements than p
        ctx = ctx * pl.reciprocal(denom, approx=True)

        HG = heads * G

        def merge(dir_off):
            # heads back onto lanes in 'b n l (h d)' order, then flatten groups
            hs = [ctx[dir_off + h * G: dir_off + (h + 1) * G] for h in range(heads)]
            return jnp.concatenate(hs, axis=-1).reshape(rows, dim)

        ctx12 = merge(0)      # direction 1: mat1 queries attending to mat2
        ctx21 = merge(HG)     # direction 2: mat2 queries attending to mat1

        # --- fused block-diagonal output projection: [ctx12|ctx21] @ [[wo1,0],[0,wo2]]
        ctx_cat = jnp.concatenate([ctx12, ctx21], axis=-1)        # (rows, 2*dim)
        o_cat = jnp.dot(ctx_cat.astype(mxu_dtype), wo_ref[...],
                        preferred_element_type=jnp.float32) + bo_ref[...]
        o12 = o_cat[:, :dim]      # out1(ctx12)
        o21 = o_cat[:, dim:]      # out2(ctx21)

        # --- residual + shared LayerNorm (f32): var = E[x^2] - mean^2
        def normalize(x):
            mu = jnp.mean(x, axis=-1, keepdims=True)
            ms = jnp.mean(x * x, axis=-1, keepdims=True)
            return (x - mu) * lax.rsqrt(ms - mu * mu + EPS)

        n21 = normalize(x1 + o21)     # mat2_to_mat1_attention (pre-affine)
        n12 = normalize(x2 + o12)     # mat1_to_mat2_attention (pre-affine)
        # gamma/beta pre-concatenated wrapper-side: single broadcast, lane-dense store
        out_ref[...] = (jnp.concatenate([n21, n12], axis=-1)
                        * g_ref[...] + beta_ref[...])             # (rows, 2*dim)

    return kernel


def msa_bidirectional_cross_attention(mat1, mat2, params,
                                      groups_per_step=None, use_bf16_mxu=False):
    B, N, L, D = mat1.shape
    H = NUM_HEADS
    dh = D // H
    G_total = B * N
    R = G_total * L

    # Tile over B*N groups. At the toy size everything fits in one "parallel"
    # step; at real MSA sizes pick groups_per_step so the per-step activations
    # + (2*H*Gt, L, L) scores fit scoped VMEM (v5e 16 MiB / v7x 32 MiB default)
    # and the grid spreads across v7x's two TensorCores.
    if groups_per_step is None:
        groups_per_step = G_total
    assert G_total % groups_per_step == 0
    num_tiles = G_total // groups_per_step
    rows_per_step = groups_per_step * L

    f32 = jnp.float32
    w_dtype = jnp.bfloat16 if use_bf16_mxu else f32

    # Fold 1/sqrt(head_dim) into the Q projection and fuse [Q | K | V] weights
    # (one-time parameter transformation).
    inv_scale = 1.0 / (float(dh) ** 0.5)
    wqkv = jnp.concatenate(
        [params['wq'] * inv_scale, params['wk'], params['wv']], axis=1).astype(w_dtype)
    bqkv = jnp.concatenate(
        [params['bq'] * inv_scale, params['bk'], params['bv']], axis=1)   # (1, 3D) f32

    # Block-diagonal fused output weight [[wo1, 0], [0, wo2]]  (2D, 2D).
    zeros = jnp.zeros((D, D), f32)
    wo_blk = jnp.concatenate(
        [jnp.concatenate([params['wo1'], zeros], axis=1),
         jnp.concatenate([zeros, params['wo2']], axis=1)], axis=0).astype(w_dtype)
    bo_cat = jnp.concatenate([params['bo1'], params['bo2']], axis=1)      # (1, 2D)

    # Shared LayerNorm affine, duplicated once for the lane-dense slab.
    g_cat = jnp.concatenate([params['ln_g'], params['ln_g']], axis=1)     # (1, 2D)
    b_cat = jnp.concatenate([params['ln_b'], params['ln_b']], axis=1)     # (1, 2D)

    x1 = mat1.reshape(R, D)
    x2 = mat2.reshape(R, D)

    def row_block(shape):
        return pl.BlockSpec(shape, lambda i: (i, 0))

    def replicated(shape):
        return pl.BlockSpec(shape, lambda i: (0, 0))

    out = pl.pallas_call(
        make_cross_attn_kernel(groups_per_step, L, D, H, use_bf16_mxu),
        out_shape=jax.ShapeDtypeStruct((R, 2 * D), f32),
        grid=(num_tiles,),
        in_specs=[
            row_block((rows_per_step, D)),       # x1 tile
            row_block((rows_per_step, D)),       # x2 tile
            replicated(wqkv.shape),              # fused QKV weight
            replicated(bqkv.shape),
            replicated(wo_blk.shape),            # block-diagonal output weight
            replicated(bo_cat.shape),
            replicated(g_cat.shape),
            replicated(b_cat.shape),
        ],
        out_specs=row_block((rows_per_step, 2 * D)),
        compiler_params=pltpu.CompilerParams(dimension_semantics=("parallel",)),
    )(x1, x2, wqkv, bqkv, wo_blk, bo_cat, g_cat, b_cat)

    # Split the lane-dense slab; same return order as the PyTorch module:
    # (mat2_to_mat1_attention, mat1_to_mat2_attention)
    out21 = out[:, :D].reshape(B, N, L, D)
    out12 = out[:, D:].reshape(B, N, L, D)
    return out21, out12


# -----------------------------------------------------------------------------
# Plain-JAX reference (mirrors the PyTorch forward 1:1) for self-checking.
# -----------------------------------------------------------------------------
def _ln_ref(x, g, b):
    mu = jnp.mean(x, axis=-1, keepdims=True)
    var = jnp.mean((x - mu) ** 2, axis=-1, keepdims=True)
    return (x - mu) * lax.rsqrt(var + EPS) * g + b


def reference_forward(mat1, mat2, params):
    B, N, L, D = mat1.shape
    H, dh = NUM_HEADS, D // NUM_HEADS
    scale = float(dh) ** 0.5

    def split_heads(x):   # b n l (h d) -> b n h l d
        return x.reshape(B, N, L, H, dh).transpose(0, 1, 3, 2, 4)

    def merge_heads(x):   # b n h l d -> b n l (h d)
        return x.transpose(0, 1, 3, 2, 4).reshape(B, N, L, D)

    def direction(q_in, kv_in, wo, bo):
        Q = split_heads(q_in @ params['wq'] + params['bq'])
        K = split_heads(kv_in @ params['wk'] + params['bk'])
        V = split_heads(kv_in @ params['wv'] + params['bv'])
        s = jnp.einsum('bnhld,bnhmd->bnhlm', Q, K) / scale
        a = jax.nn.softmax(s, axis=-1)
        ctx = merge_heads(jnp.einsum('bnhlm,bnhmd->bnhld', a, V))
        o = ctx @ wo + bo
        return _ln_ref(kv_in + o, params['ln_g'], params['ln_b'])

    mat1_to_mat2 = direction(mat1, mat2, params['wo1'], params['bo1'])
    mat2_to_mat1 = direction(mat2, mat1, params['wo2'], params['bo2'])
    return mat2_to_mat1, mat1_to_mat2


# -----------------------------------------------------------------------------
# Deterministic parameter init (shapes match the module's nn.Linear / LayerNorm).
# -----------------------------------------------------------------------------
def init_params(key):
    D = EMBED_DIM
    f32 = jnp.float32
    s = 0.05
    ks = jax.random.split(key, 10)

    def lin(kw, kb, din, dout):
        return (jax.random.normal(kw, (din, dout), f32) * s,
                jax.random.normal(kb, (1, dout), f32) * s)

    wq, bq = lin(ks[0], ks[1], D, D)
    wk, bk = lin(ks[2], ks[3], D, D)
    wv, bv = lin(ks[4], ks[5], D, D)
    wo1, bo1 = lin(ks[6], ks[7], D, D)
    wo2, bo2 = lin(ks[8], ks[9], D, D)
    return dict(wq=wq, bq=bq, wk=wk, bk=bk, wv=wv, bv=bv,
                wo1=wo1, bo1=bo1, wo2=wo2, bo2=bo2,
                ln_g=jnp.ones((1, D), f32), ln_b=jnp.zeros((1, D), f32))


if __name__ == "__main__":
    key = jax.random.PRNGKey(0)
    kp, k1, k2 = jax.random.split(key, 3)
    params = init_params(kp)

    mat1 = jax.random.normal(k1, (BATCH, NUM_SEQ, SEQ_LEN, EMBED_DIM), jnp.float32)
    mat2 = jax.random.normal(k2, (BATCH, NUM_SEQ, SEQ_LEN, EMBED_DIM), jnp.float32)

    fwd = jax.jit(msa_bidirectional_cross_attention)
    out21, out12 = fwd(mat1, mat2, params)
    out21, out12 = jax.block_until_ready((out21, out12))

    assert out21.shape == mat1.shape and out12.shape == mat2.shape
    assert bool(jnp.all(jnp.isfinite(out21))) and bool(jnp.all(jnp.isfinite(out12)))

    ref21, ref12 = reference_forward(mat1, mat2, params)
    err = max(float(jnp.max(jnp.abs(out21 - ref21))),
              float(jnp.max(jnp.abs(out12 - ref12))))
    assert err < 1e-2, f"mismatch vs plain-JAX reference: {err}"

    print("KERNEL_OK")
</pallas_src>

<mosaic_0001>
module attributes {stable_mosaic.version = 11 : i64} {
  func.func @kernel(%arg0: i32, %arg1: memref<48x32xf32, #tpu.memory_space<vmem>>, %arg2: memref<48x32xf32, #tpu.memory_space<vmem>>, %arg3: memref<32x96xf32, #tpu.memory_space<vmem>>, %arg4: memref<1x96xf32, #tpu.memory_space<vmem>>, %arg5: memref<64x64xf32, #tpu.memory_space<vmem>>, %arg6: memref<1x64xf32, #tpu.memory_space<vmem>>, %arg7: memref<1x64xf32, #tpu.memory_space<vmem>>, %arg8: memref<1x64xf32, #tpu.memory_space<vmem>>, %arg9: memref<48x64xf32, #tpu.memory_space<vmem>>) attributes {dimension_semantics = [#tpu.dimension_semantics<parallel>], iteration_bounds = array<i64: 1>, scalar_prefetch = 0 : i64, scratch_operands = 0 : i64, tpu.core_type = #tpu.core_type<tc>, window_params = [{transform_indices = @transform_0, window_bounds = array<i64: 48, 32>}, {transform_indices = @transform_1, window_bounds = array<i64: 48, 32>}, {pipeline_mode = #tpu.pipeline_mode<synchronous>, transform_indices = @transform_2, window_bounds = array<i64: 32, 96>}, {pipeline_mode = #tpu.pipeline_mode<synchronous>, transform_indices = @transform_3, window_bounds = array<i64: 1, 96>}, {pipeline_mode = #tpu.pipeline_mode<synchronous>, transform_indices = @transform_4, window_bounds = array<i64: 64, 64>}, {pipeline_mode = #tpu.pipeline_mode<synchronous>, transform_indices = @transform_5, window_bounds = array<i64: 1, 64>}, {pipeline_mode = #tpu.pipeline_mode<synchronous>, transform_indices = @transform_6, window_bounds = array<i64: 1, 64>}, {pipeline_mode = #tpu.pipeline_mode<synchronous>, transform_indices = @transform_7, window_bounds = array<i64: 1, 64>}, {transform_indices = @transform_8, window_bounds = array<i64: 48, 64>}]} {
    %c0 = arith.constant 0 : index
    %c0_0 = arith.constant 0 : index
    %0 = vector.load %arg1[%c0, %c0_0] : memref<48x32xf32, #tpu.memory_space<vmem>>, vector<48x32xf32>
    %c0_1 = arith.constant 0 : index
    %c0_2 = arith.constant 0 : index
    %1 = vector.load %arg2[%c0_1, %c0_2] : memref<48x32xf32, #tpu.memory_space<vmem>>, vector<48x32xf32>
    %c0_3 = arith.constant 0 : index
    %c0_4 = arith.constant 0 : index
    %2 = vector.load %arg3[%c0_3, %c0_4] : memref<32x96xf32, #tpu.memory_space<vmem>>, vector<32x96xf32>
    %c0_5 = arith.constant 0 : index
    %c0_6 = arith.constant 0 : index
    %3 = vector.load %arg4[%c0_5, %c0_6] : memref<1x96xf32, #tpu.memory_space<vmem>>, vector<1x96xf32>
    %cst = arith.constant dense<0.000000e+00> : vector<48x96xf32>
    %4 = tpu.matmul %0, %2, %cst {dimension_numbers = #tpu.dot_dimension_numbers<[1], [0], [0], [1], [0, 0, 1, 1], [], []>} : vector<48x32xf32>, vector<32x96xf32>, vector<48x96xf32> -> vector<48x96xf32>
    %5 = vector.broadcast %3 : vector<1x96xf32> to vector<48x96xf32>
    %6 = arith.addf %4, %5 : vector<48x96xf32>
    %cst_7 = arith.constant dense<0.000000e+00> : vector<48x96xf32>
    %7 = tpu.matmul %1, %2, %cst_7 {dimension_numbers = #tpu.dot_dimension_numbers<[1], [0], [0], [1], [0, 0, 1, 1], [], []>} : vector<48x32xf32>, vector<32x96xf32>, vector<48x96xf32> -> vector<48x96xf32>
    %8 = vector.broadcast %3 : vector<1x96xf32> to vector<48x96xf32>
    %9 = arith.addf %7, %8 : vector<48x96xf32>
    %10 = vector.extract_strided_slice %6 {offsets = [0, 0], sizes = [48, 16], strides = [1, 1]} : vector<48x96xf32> to vector<48x16xf32>
    %11 = vector.shape_cast %10 : vector<48x16xf32> to vector<6x8x16xf32>
    %12 = vector.extract_strided_slice %6 {offsets = [0, 16], sizes = [48, 16], strides = [1, 1]} : vector<48x96xf32> to vector<48x16xf32>
    %13 = vector.shape_cast %12 : vector<48x16xf32> to vector<6x8x16xf32>
    %14 = vector.extract_strided_slice %9 {offsets = [0, 0], sizes = [48, 16], strides = [1, 1]} : vector<48x96xf32> to vector<48x16xf32>
    %15 = vector.shape_cast %14 : vector<48x16xf32> to vector<6x8x16xf32>
    %16 = vector.extract_strided_slice %9 {offsets = [0, 16], sizes = [48, 16], strides = [1, 1]} : vector<48x96xf32> to vector<48x16xf32>
    %17 = vector.shape_cast %16 : vector<48x16xf32> to vector<6x8x16xf32>
    %18 = vector.extract_strided_slice %6 {offsets = [0, 32], sizes = [48, 16], strides = [1, 1]} : vector<48x96xf32> to vector<48x16xf32>
    %19 = vector.shape_cast %18 : vector<48x16xf32> to vector<6x8x16xf32>
    %20 = vector.extract_strided_slice %6 {offsets = [0, 48], sizes = [48, 16], strides = [1, 1]} : vector<48x96xf32> to vector<48x16xf32>
    %21 = vector.shape_cast %20 : vector<48x16xf32> to vector<6x8x16xf32>
    %22 = vector.extract_strided_slice %9 {offsets = [0, 32], sizes = [48, 16], strides = [1, 1]} : vector<48x96xf32> to vector<48x16xf32>
    %23 = vector.shape_cast %22 : vector<48x16xf32> to vector<6x8x16xf32>
    %24 = vector.extract_strided_slice %9 {offsets = [0, 48], sizes = [48, 16], strides = [1, 1]} : vector<48x96xf32> to vector<48x16xf32>
    %25 = vector.shape_cast %24 : vector<48x16xf32> to vector<6x8x16xf32>
    %26 = vector.extract_strided_slice %6 {offsets = [0, 64], sizes = [48, 16], strides = [1, 1]} : vector<48x96xf32> to vector<48x16xf32>
    %27 = vector.shape_cast %26 : vector<48x16xf32> to vector<6x8x16xf32>
    %28 = vector.extract_strided_slice %6 {offsets = [0, 80], sizes = [48, 16], strides = [1, 1]} : vector<48x96xf32> to vector<48x16xf32>
    %29 = vector.shape_cast %28 : vector<48x16xf32> to vector<6x8x16xf32>
    %30 = vector.extract_strided_slice %9 {offsets = [0, 64], sizes = [48, 16], strides = [1, 1]} : vector<48x96xf32> to vector<48x16xf32>
    %31 = vector.shape_cast %30 : vector<48x16xf32> to vector<6x8x16xf32>
    %32 = vector.extract_strided_slice %9 {offsets = [0, 80], sizes = [48, 16], strides = [1, 1]} : vector<48x96xf32> to vector<48x16xf32>
    %33 = vector.shape_cast %32 : vector<48x16xf32> to vector<6x8x16xf32>
    %34 = tpu.concatenate %11, %13, %15, %17 in 0 : vector<6x8x16xf32>, vector<6x8x16xf32>, vector<6x8x16xf32>, vector<6x8x16xf32> -> vector<24x8x16xf32>
    %35 = tpu.concatenate %23, %25, %19, %21 in 0 : vector<6x8x16xf32>, vector<6x8x16xf32>, vector<6x8x16xf32>, vector<6x8x16xf32> -> vector<24x8x16xf32>
    %36 = tpu.concatenate %31, %33, %27, %29 in 0 : vector<6x8x16xf32>, vector<6x8x16xf32>, vector<6x8x16xf32>, vector<6x8x16xf32> -> vector<24x8x16xf32>
    "tpu.trace_start"() <{level = 10 : i32, message = "bqd,bkd->bqk"}> : () -> ()
    %cst_8 = arith.constant dense<0.000000e+00> : vector<24x8x8xf32>
    %37 = tpu.matmul %34, %35, %cst_8 {dimension_numbers = #tpu.dot_dimension_numbers<[2], [2], [1], [1], [0, 0, 0, 1, 1, 1], [0], [0]>} : vector<24x8x16xf32>, vector<24x8x16xf32>, vector<24x8x8xf32> -> vector<24x8x8xf32>
    "tpu.trace_stop"() : () -> ()
    %cst_9 = arith.constant dense<0xFF800000> : vector<24x8xf32>
    %38 = vector.multi_reduction <maximumf>, %37, %cst_9 [2] : vector<24x8x8xf32> to vector<24x8xf32>
    %39 = vector.shape_cast %38 : vector<24x8xf32> to vector<24x8x1xf32>
    %40 = vector.broadcast %39 : vector<24x8x1xf32> to vector<24x8x8xf32>
    %41 = arith.subf %37, %40 : vector<24x8x8xf32>
    %42 = math.exp %41 : vector<24x8x8xf32>
    %cst_10 = arith.constant dense<0.000000e+00> : vector<24x8xf32>
    %43 = vector.multi_reduction <add>, %42, %cst_10 [2] : vector<24x8x8xf32> to vector<24x8xf32>
    %44 = vector.shape_cast %43 : vector<24x8xf32> to vector<24x8x1xf32>
    "tpu.trace_start"() <{level = 10 : i32, message = "bqk,bkd->bqd"}> : () -> ()
    %cst_11 = arith.constant dense<0.000000e+00> : vector<24x8x16xf32>
    %45 = tpu.matmul %42, %36, %cst_11 {dimension_numbers = #tpu.dot_dimension_numbers<[2], [1], [1], [2], [0, 0, 0, 1, 1, 2], [0], [0]>} : vector<24x8x8xf32>, vector<24x8x16xf32>, vector<24x8x16xf32> -> vector<24x8x16xf32>
    "tpu.trace_stop"() : () -> ()
    %46 = tpu.reciprocal %44 {approx = true} : vector<24x8x1xf32> -> vector<24x8x1xf32>
    %47 = vector.broadcast %46 : vector<24x8x1xf32> to vector<24x8x16xf32>
    %48 = arith.mulf %45, %47 : vector<24x8x16xf32>
    %49 = vector.extract_strided_slice %48 {offsets = [0, 0, 0], sizes = [6, 8, 16], strides = [1, 1, 1]} : vector<24x8x16xf32> to vector<6x8x16xf32>
    %50 = vector.extract_strided_slice %48 {offsets = [6, 0, 0], sizes = [6, 8, 16], strides = [1, 1, 1]} : vector<24x8x16xf32> to vector<6x8x16xf32>
    %51 = tpu.concatenate %49, %50 in 2 : vector<6x8x16xf32>, vector<6x8x16xf32> -> vector<6x8x32xf32>
    %52 = vector.shape_cast %51 : vector<6x8x32xf32> to vector<48x32xf32>
    %53 = vector.extract_strided_slice %48 {offsets = [12, 0, 0], sizes = [6, 8, 16], strides = [1, 1, 1]} : vector<24x8x16xf32> to vector<6x8x16xf32>
    %54 = vector.extract_strided_slice %48 {offsets = [18, 0, 0], sizes = [6, 8, 16], strides = [1, 1, 1]} : vector<24x8x16xf32> to vector<6x8x16xf32>
    %55 = tpu.concatenate %53, %54 in 2 : vector<6x8x16xf32>, vector<6x8x16xf32> -> vector<6x8x32xf32>
    %56 = vector.shape_cast %55 : vector<6x8x32xf32> to vector<48x32xf32>
    %57 = tpu.concatenate %52, %56 in 1 : vector<48x32xf32>, vector<48x32xf32> -> vector<48x64xf32>
    %c0_12 = arith.constant 0 : index
    %c0_13 = arith.constant 0 : index
    %58 = vector.load %arg5[%c0_12, %c0_13] : memref<64x64xf32, #tpu.memory_space<vmem>>, vector<64x64xf32>
    %cst_14 = arith.constant dense<0.000000e+00> : vector<48x64xf32>
    %59 = tpu.matmul %57, %58, %cst_14 {dimension_numbers = #tpu.dot_dimension_numbers<[1], [0], [0], [1], [0, 0, 1, 1], [], []>} : vector<48x64xf32>, vector<64x64xf32>, vector<48x64xf32> -> vector<48x64xf32>
    %c0_15 = arith.constant 0 : index
    %c0_16 = arith.constant 0 : index
    %60 = vector.load %arg6[%c0_15, %c0_16] : memref<1x64xf32, #tpu.memory_space<vmem>>, vector<1x64xf32>
    %61 = vector.broadcast %60 : vector<1x64xf32> to vector<48x64xf32>
    %62 = arith.addf %59, %61 : vector<48x64xf32>
    %63 = vector.extract_strided_slice %62 {offsets = [0, 0], sizes = [48, 32], strides = [1, 1]} : vector<48x64xf32> to vector<48x32xf32>
    %64 = vector.extract_strided_slice %62 {offsets = [0, 32], sizes = [48, 32], strides = [1, 1]} : vector<48x64xf32> to vector<48x32xf32>
    %65 = arith.addf %0, %64 : vector<48x32xf32>
    %cst_17 = arith.constant dense<0.000000e+00> : vector<48xf32>
    %66 = vector.multi_reduction <add>, %65, %cst_17 [1] : vector<48x32xf32> to vector<48xf32>
    %67 = vector.shape_cast %66 : vector<48xf32> to vector<48x1xf32>
    %cst_18 = arith.constant 3.200000e+01 : f32
    %68 = vector.broadcast %cst_18 : f32 to vector<48x1xf32>
    %69 = arith.divf %67, %68 : vector<48x1xf32>
    %70 = arith.mulf %65, %65 : vector<48x32xf32>
    %cst_19 = arith.constant dense<0.000000e+00> : vector<48xf32>
    %71 = vector.multi_reduction <add>, %70, %cst_19 [1] : vector<48x32xf32> to vector<48xf32>
    %72 = vector.shape_cast %71 : vector<48xf32> to vector<48x1xf32>
    %cst_20 = arith.constant 3.200000e+01 : f32
    %73 = vector.broadcast %cst_20 : f32 to vector<48x1xf32>
    %74 = arith.divf %72, %73 : vector<48x1xf32>
    %75 = vector.broadcast %69 : vector<48x1xf32> to vector<48x32xf32>
    %76 = arith.subf %65, %75 : vector<48x32xf32>
    %77 = arith.mulf %69, %69 : vector<48x1xf32>
    %78 = arith.subf %74, %77 : vector<48x1xf32>
    %cst_21 = arith.constant 9.99999974E-6 : f32
    %79 = vector.broadcast %cst_21 : f32 to vector<48x1xf32>
    %80 = arith.addf %78, %79 : vector<48x1xf32>
    %81 = math.rsqrt %80 : vector<48x1xf32>
    %82 = vector.broadcast %81 : vector<48x1xf32> to vector<48x32xf32>
    %83 = arith.mulf %76, %82 : vector<48x32xf32>
    %84 = arith.addf %1, %63 : vector<48x32xf32>
    %cst_22 = arith.constant dense<0.000000e+00> : vector<48xf32>
    %85 = vector.multi_reduction <add>, %84, %cst_22 [1] : vector<48x32xf32> to vector<48xf32>
    %86 = vector.shape_cast %85 : vector<48xf32> to vector<48x1xf32>
    %cst_23 = arith.constant 3.200000e+01 : f32
    %87 = vector.broadcast %cst_23 : f32 to vector<48x1xf32>
    %88 = arith.divf %86, %87 : vector<48x1xf32>
    %89 = arith.mulf %84, %84 : vector<48x32xf32>
    %cst_24 = arith.constant dense<0.000000e+00> : vector<48xf32>
    %90 = vector.multi_reduction <add>, %89, %cst_24 [1] : vector<48x32xf32> to vector<48xf32>
    %91 = vector.shape_cast %90 : vector<48xf32> to vector<48x1xf32>
    %cst_25 = arith.constant 3.200000e+01 : f32
    %92 = vector.broadcast %cst_25 : f32 to vector<48x1xf32>
    %93 = arith.divf %91, %92 : vector<48x1xf32>
    %94 = vector.broadcast %88 : vector<48x1xf32> to vector<48x32xf32>
    %95 = arith.subf %84, %94 : vector<48x32xf32>
    %96 = arith.mulf %88, %88 : vector<48x1xf32>
    %97 = arith.subf %93, %96 : vector<48x1xf32>
    %cst_26 = arith.constant 9.99999974E-6 : f32
    %98 = vector.broadcast %cst_26 : f32 to vector<48x1xf32>
    %99 = arith.addf %97, %98 : vector<48x1xf32>
    %100 = math.rsqrt %99 : vector<48x1xf32>
    %101 = vector.broadcast %100 : vector<48x1xf32> to vector<48x32xf32>
    %102 = arith.mulf %95, %101 : vector<48x32xf32>
    %103 = tpu.concatenate %83, %102 in 1 : vector<48x32xf32>, vector<48x32xf32> -> vector<48x64xf32>
    %c0_27 = arith.constant 0 : index
    %c0_28 = arith.constant 0 : index
    %104 = vector.load %arg7[%c0_27, %c0_28] : memref<1x64xf32, #tpu.memory_space<vmem>>, vector<1x64xf32>
    %105 = vector.broadcast %104 : vector<1x64xf32> to vector<48x64xf32>
    %106 = arith.mulf %103, %105 : vector<48x64xf32>
    %c0_29 = arith.constant 0 : index
    %c0_30 = arith.constant 0 : index
    %107 = vector.load %arg8[%c0_29, %c0_30] : memref<1x64xf32, #tpu.memory_space<vmem>>, vector<1x64xf32>
    %108 = vector.broadcast %107 : vector<1x64xf32> to vector<48x64xf32>
    %109 = arith.addf %106, %108 : vector<48x64xf32>
    %c0_31 = arith.constant 0 : index
    %c0_32 = arith.constant 0 : index
    %110 = vector.load %arg9[%c0_31, %c0_32] : memref<48x64xf32, #tpu.memory_space<vmem>>, vector<48x64xf32>
    tpu.vector_store %arg9[%c0_31, %c0_32], %109 {strides = array<i32>} : memref<48x64xf32, #tpu.memory_space<vmem>>, vector<48x64xf32>,
    return
  }
  func.func @transform_0(%arg0: i32) -> (i32, i32) {
    %c0_i32 = arith.constant 0 : i32
    %c0_i32_0 = arith.constant 0 : i32
    return %arg0, %c0_i32 : i32, i32
  }
  func.func @transform_1(%arg0: i32) -> (i32, i32) {
    %c0_i32 = arith.constant 0 : i32
    %c0_i32_0 = arith.constant 0 : i32
    return %arg0, %c0_i32 : i32, i32
  }
  func.func @transform_2(%arg0: i32) -> (i32, i32) {
    %c0_i32 = arith.constant 0 : i32
    %c0_i32_0 = arith.constant 0 : i32
    %c0_i32_1 = arith.constant 0 : i32
    return %c0_i32, %c0_i32_0 : i32, i32
  }
  func.func @transform_3(%arg0: i32) -> (i32, i32) {
    %c0_i32 = arith.constant 0 : i32
    %c0_i32_0 = arith.constant 0 : i32
    %c0_i32_1 = arith.constant 0 : i32
    return %c0_i32, %c0_i32_0 : i32, i32
  }
  func.func @transform_4(%arg0: i32) -> (i32, i32) {
    %c0_i32 = arith.constant 0 : i32
    %c0_i32_0 = arith.constant 0 : i32
    %c0_i32_1 = arith.constant 0 : i32
    return %c0_i32, %c0_i32_0 : i32, i32
  }
  func.func @transform_5(%arg0: i32) -> (i32, i32) {
    %c0_i32 = arith.constant 0 : i32
    %c0_i32_0 = arith.constant 0 : i32
    %c0_i32_1 = arith.constant 0 : i32
    return %c0_i32, %c0_i32_0 : i32, i32
  }
  func.func @transform_6(%arg0: i32) -> (i32, i32) {
    %c0_i32 = arith.constant 0 : i32
    %c0_i32_0 = arith.constant 0 : i32
    %c0_i32_1 = arith.constant 0 : i32
    return %c0_i32, %c0_i32_0 : i32, i32
  }
  func.func @transform_7(%arg0: i32) -> (i32, i32) {
    %c0_i32 = arith.constant 0 : i32
    %c0_i32_0 = arith.constant 0 : i32
    %c0_i32_1 = arith.constant 0 : i32
    return %c0_i32, %c0_i32_0 : i32, i32
  }
  func.func @transform_8(%arg0: i32) -> (i32, i32) {
    %c0_i32 = arith.constant 0 : i32
    %c0_i32_0 = arith.constant 0 : i32
    return %arg0, %c0_i32 : i32, i32
  }
}

</mosaic_0001>

<bundles_post_ra>
// kernel: msa_bidirectional_cross_attention.1
= control target key start
LH: loop header
LB: loop body
LE: loop exit
PB: predicated region body
PF: predicated region fallthrough
CT: control target
= control target key end

     0   :  { %vm52_vm0 = vcmask 261120   ;;  %s5393_s16 = smov 112   ;;  %v5394_v35 = vmov 0.0   ;;  %vm5395_vm1 = vmmov 0   ;;  %vm317_vm2 = vcmask 130048   ;;  %s5397_s17 = smov 64   ;;  %s6511_s2 = inlined_call_operand.vmem [shape: f32[32,96], index: 2, kind: input, shape index: {}]   ;;  %s6512_s0 = inlined_call_operand.vmem [shape: f32[48,32], index: 0, kind: input, shape index: {}]   ;;  %s6513_s1 = inlined_call_operand.vmem [shape: f32[48,32], index: 1, kind: input, shape index: {}]   ;;  %s6514_s3 = inlined_call_operand.vmem [shape: f32[1,96], index: 3, kind: input, shape index: {}]   ;;  %s6515_s4 = inlined_call_operand.vmem [shape: f32[64,64], index: 4, kind: input, shape index: {}]   ;;  %s6516_s5 = inlined_call_operand.vmem [shape: f32[1,64], index: 5, kind: input, shape index: {}]   ;;  %s6517_s6 = inlined_call_operand.vmem [shape: f32[1,64], index: 6, kind: input, shape index: {}]   ;;  %s6518_s7 = inlined_call_operand.vmem [shape: f32[1,64], index: 7, kind: input, shape index: {}]   ;;  %s6519_s8 = inlined_call_operand.vmem [shape: f32[48,64], index: 8, kind: output, shape index: {}]  }
   0x1   :  { %v44_v0 = vld [vmem:[%s6511_s2 + $0x18] sm:$0xff]  ;;  %v43_v1 = vld [vmem:[%s6511_s2 + $0x10] sm:$0xff]  ;;  %v29_v2 = vld [vmem:[%s6512_s0] sm:$0xff]  ;;  %4989 = vmatprep.subr.mxu0 %v5394_v35  ;;  %4991 = vmatprep.mubr.msk.f32.mxu0 %vm5395_vm1, %v5394_v35  ;;  %vm2140_vm3 = vcmask 64512   ;;  %s5398_s18 = smov 16   ;;  %s5399_s12 = smov 32  }
   0x2   :  { %4955 = vmatprep.subr.mxu1 %v44_v0  ;;  %v42_v3 = vld [vmem:[%s6511_s2 + $0x8] sm:$0xff]  ;;  %4963 = vmatprep.mubr.msk.f32.mxu1 %vm52_vm0, %v29_v2  ;;  %v41_v4 = vld [vmem:[%s6511_s2] sm:$0xff]  ;;  %v31_v6 = vld [vmem:[%s6512_s0 + $0x10] sm:$0xff]  ;;  %vm4334_vm4 = vcmask 523264  }
   0x3   :  { %4956 = vmatpush3.msra.mxu1 %v44_v0  ;;  %v30_v5 = vld [vmem:[%s6512_s0 + $0x8] sm:$0xff]  ;;  %v32_v7 = vld [vmem:[%s6512_s0 + $0x18] sm:$0xff]  ;;  %v33_v8 = vld [vmem:[%s6512_s0 + $0x20] sm:$0xff] }
   0x4   :  { %4957 = vmatprep.subr.mxu1 %v43_v1  ;;  %v34_v9 = vld [vmem:[%s6512_s0 + $0x28] sm:$0xff]  ;;  %v35_v10 = vld [vmem:[%s6513_s1] sm:$0xff]  ;;  %v37_v12 = vld [vmem:[%s6513_s1 + $0x10] sm:$0xff] }
   0x5   :  { %4958 = vmatpush3.msra.mxu1 %v43_v1  ;;  %v36_v11 = vld [vmem:[%s6513_s1 + $0x8] sm:$0xff]  ;;  %v38_v13 = vld [vmem:[%s6513_s1 + $0x18] sm:$0xff]  ;;  %v39_v14 = vld [vmem:[%s6513_s1 + $0x20] sm:$0xff] }
   0x6   :  { %4959 = vmatprep.subr.mxu1 %v42_v3  ;;  %v40_v15 = vld [vmem:[%s6513_s1 + $0x28] sm:$0xff]  ;;  %v4731_v23 = vld [vmem:[%s6514_s3] ss:$0 sm:$0xff]  ;;  %s5396_s3 = smov 96  }
   0x7   :  { %4960 = vmatpush3.msra.mxu1 %v42_v3 }
   0x8   :  { %4961 = vmatprep.subr.mxu1 %v41_v4 }
   0x9   :  { %4962 = vmatpush3.msra.mxu1 %v41_v4 }
   0xa   :  { %4964 = vmatmul.mubr.msk.f32.vlgmr.msra.gmra.mxu1 %vm52_vm0, %v30_v5  ;;  %4972 = vmatprep.subr.mxu1 %v44_v0 }
   0xb   :  { %4973 = vmatpush3.msra.mxu1 %v44_v0  ;;  %4966 = vmatprep.mubr.msk.f32.mxu1 %vm52_vm0, %v31_v6 }
   0xc   :  { %4974 = vmatprep.subr.mxu1 %v43_v1 }
   0xd   :  { %4975 = vmatpush3.msra.mxu1 %v43_v1 }
   0xe   :  { %4967 = vmatmul.mubr.msk.f32.gmra.mxu1 %vm52_vm0, %v32_v7  ;;  %4976 = vmatprep.subr.mxu1 %v42_v3 }
   0xf   :  { %4969 = vmatprep.mubr.msk.f32.mxu1 %vm52_vm0, %v33_v8  ;;  %4977 = vmatpush3.msra.mxu1 %v42_v3 }
  0x10   :  { %4978 = vmatprep.subr.mxu1 %v41_v4 }
  0x11   :  { %4979 = vmatpush3.msra.mxu1 %v41_v4 }
  0x12   :  { %4970 = vmatmul.mubr.msk.f32.gmra.mxu1 %vm52_vm0, %v34_v9  ;;  %4994 = vmatprep.subr.mxu1 %v5394_v35 }
  0x13   :  { %4980 = vmatprep.mubr.msk.f32.mxu1 %vm52_vm0, %v35_v10 }
  0x16   :  { %4981 = vmatmul.mubr.msk.f32.vlgmr.msra.gmra.mxu1 %vm52_vm0, %v36_v11 }
  0x17   :  { %4983 = vmatprep.mubr.msk.f32.mxu1 %vm52_vm0, %v37_v12 }
  0x1a   :  { %4984 = vmatmul.mubr.msk.f32.gmra.mxu1 %vm52_vm0, %v38_v13 }
  0x1b   :  { %4986 = vmatprep.mubr.msk.f32.mxu1 %vm52_vm0, %v39_v14 }
  0x1e   :  { %4987 = vmatmul.mubr.msk.f32.gmra.mxu1 %vm52_vm0, %v40_v15 }
  0x1f   :  { %4996 = vmatprep.mubr.msk.f32.mxu1 %vm5395_vm1, %v5394_v35 }
  0xca   :  { %v4965_v16 = vpop.f32.mrf.mxu1 }
  0xcb   :  { %v5542_v37 = vadd.f32 %v4965_v16, %v4731_v23 }
  0xcc   :  { %v137_v17 = vpop.f32.mrf.mxu1 }
  0xcd   :  { %v5532_v36 = vadd.f32 %v4731_v23, %v137_v17 }
  0xce   :  { %v4968_v18 = vpop.f32.mrf.mxu1 }
  0xcf   :  { %v5550_v39 = vadd.f32 %v4968_v18, %v4731_v23 }
  0xd0   :  { %v147_v19 = vpop.f32.mrf.mxu1 }
  0xd1   :  { %v5544_v38 = vadd.f32 %v4731_v23, %v147_v19 }
  0xd2   :  { %v4971_v20 = vpop.f32.mrf.mxu1 }
  0xd3   :  { %v5558_v41 = vadd.f32 %v4971_v20, %v4731_v23 }
  0xd4   :  { %v157_v21 = vpop.f32.mrf.mxu1 }
  0xd5   :  { %v5552_v40 = vadd.f32 %v4731_v23, %v157_v21 }
  0xd6   :  { %v4982_v22 = vpop.f32.mrf.mxu1 }
  0xd7   :  { %v5512_v28 = vadd.f32 %v4982_v22, %v4731_v23 }
  0xd8   :  { %v250_v24 = vpop.f32.mrf.mxu1 }
  0xd9   :  { %v5508_v25 = vadd.f32 %v4731_v23, %v250_v24 }
  0xda   :  { %v4985_v26 = vpop.f32.mrf.mxu1 }
  0xdb   :  { %303 = vrot.lane.b32.xlu0 %v5508_v25, %s5393_s16  ;;  %v5520_v32 = vadd.f32 %v4985_v26, %v4731_v23 }
  0xdc   :  { %v260_v27 = vpop.f32.mrf.mxu1 }
  0xdd   :  { %v5514_v29 = vadd.f32 %v4731_v23, %v260_v27 }
  0xde   :  { %v4988_v30 = vpop.f32.mrf.mxu1 }
  0xdf   :  { %307 = vrot.lane.b32.xlu1 %v5514_v29, %s5393_s16  ;;  %305 = vrot.lane.b32.xlu0 %v5512_v28, %s5393_s16  ;;  %v5524_v34 = vadd.f32 %v4988_v30, %v4731_v23 }
  0xe0   :  { %v270_v31 = vpop.f32.mrf.mxu1 }
  0xe1   :  { %v5522_v33 = vadd.f32 %v4731_v23, %v270_v31 }
  0xe3   :  { %309 = vrot.lane.b32.xlu1 %v5520_v32, %s5393_s16  ;;  %311 = vrot.lane.b32.xlu0 %v5522_v33, %s5393_s16 }
  0xe7   :  { %313 = vrot.lane.b32.xlu1 %v5524_v34, %s5393_s16  ;;  %285 = vrot.lane.b32.xlu0 %v5532_v36, %s5393_s16 }
  0xeb   :  { %287 = vrot.lane.b32.xlu1 %v5542_v37, %s5393_s16  ;;  %289 = vrot.lane.b32.xlu0 %v5544_v38, %s5393_s16 }
  0xef   :  { %291 = vrot.lane.b32.xlu1 %v5550_v39, %s5393_s16  ;;  %293 = vrot.lane.b32.xlu0 %v5552_v40, %s5393_s16 }
  0xf3   :  { %295 = vrot.lane.b32.xlu1 %v5558_v41, %s5393_s16  ;;  %315 = vrot.lane.b32.xlu0 %v5508_v25, %s5396_s3 }
  0xf7   :  { %392 = vrot.lane.b32.xlu1 %v5512_v28, %s5396_s3  ;;  %468 = vrot.lane.b32.xlu0 %v5514_v29, %s5396_s3 }
  0xfb   :  { %544 = vrot.lane.b32.xlu1 %v5520_v32, %s5396_s3  ;;  %620 = vrot.lane.b32.xlu0 %v5522_v33, %s5396_s3 }
  0xff   :  { %696 = vrot.lane.b32.xlu1 %v5524_v34, %s5396_s3 }
 0x14d   :  { %v5574_v42 = vpop.permute.xlu0 %303 }
 0x14e   :  { %772 = vrot.lane.b32.xlu0 %v5574_v42, %s5396_s3 }
 0x151   :  { %v5578_v43 = vpop.permute.xlu1 %307  ;;  %v5580_v44 = vpop.permute.xlu0 %305 }
 0x152   :  { %848 = vrot.lane.b32.xlu1 %v5580_v44, %s5396_s3  ;;  %924 = vrot.lane.b32.xlu0 %v5578_v43, %s5396_s3 }
 0x155   :  { %v5586_v45 = vpop.permute.xlu1 %309  ;;  %v5588_v46 = vpop.permute.xlu0 %311 }
 0x156   :  { %1000 = vrot.lane.b32.xlu1 %v5586_v45, %s5396_s3  ;;  %1076 = vrot.lane.b32.xlu0 %v5588_v46, %s5396_s3 }
 0x159   :  { %v5594_v47 = vpop.permute.xlu1 %313  ;;  %v5596_v48 = vpop.permute.xlu0 %285 }
 0x15a   :  { %1152 = vrot.lane.b32.xlu1 %v5594_v47, %s5396_s3  ;;  %1228 = vrot.lane.b32.xlu0 %v5532_v36, %s5396_s3 }
 0x15d   :  { %v5602_v49 = vpop.permute.xlu1 %287  ;;  %v5604_v50 = vpop.permute.xlu0 %289 }
 0x15e   :  { %1304 = vrot.lane.b32.xlu1 %v5542_v37, %s5396_s3  ;;  %1380 = vrot.lane.b32.xlu0 %v5544_v38, %s5396_s3 }
 0x161   :  { %v5610_v51 = vpop.permute.xlu1 %291  ;;  %v5612_v52 = vpop.permute.xlu0 %293 }
 0x162   :  { %1456 = vrot.lane.b32.xlu1 %v5550_v39, %s5396_s3  ;;  %1532 = vrot.lane.b32.xlu0 %v5552_v40, %s5396_s3 }
 0x165   :  { %v5618_v53 = vpop.permute.xlu1 %295  ;;  %v316_v54 = vpop.permute.xlu0 %315 }
 0x166   :  { %1608 = vrot.lane.b32.xlu1 %v5558_v41, %s5396_s3  ;;  %1684 = vrot.lane.b32.xlu0 %v5596_v48, %s5396_s3 }
 0x167   :  { %4990 = vmatpush3.xpose.msk.msra.mxu0 %vm317_vm2, %v316_v54 }
 0x168   :  { %4999 = vmatprep.subr.mxu0 %v5394_v35 }
 0x169   :  { %v393_v55 = vpop.permute.xlu1 %392  ;;  %v469_v56 = vpop.permute.xlu0 %468 }
 0x16a   :  { %4992 = vmatmul.mubr.msk.f32.vlgmr.msra.gmra.mxu0 %vm317_vm2, %v5532_v36  ;;  %4995 = vmatpush3.xpose.msk.msra.mxu1 %vm317_vm2, %v393_v55 }
 0x16b   :  { %1760 = vrot.lane.b32.xlu1 %v5602_v49, %s5396_s3  ;;  %1836 = vrot.lane.b32.xlu0 %v5604_v50, %s5396_s3 }
 0x16c   :  { %5000 = vmatpush3.xpose.msk.msra.mxu0 %vm317_vm2, %v469_v56  ;;  %5001 = vmatprep.mubr.msk.f32.mxu0 %vm5395_vm1, %v5394_v35 }
 0x16d   :  { %4997 = vmatmul.mubr.msk.f32.vlgmr.msra.gmra.mxu1 %vm317_vm2, %v5542_v37  ;;  %5004 = vmatprep.subr.mxu1 %v5394_v35  ;;  %v545_v57 = vpop.permute.xlu1 %544  ;;  %v621_v58 = vpop.permute.xlu0 %620 }
 0x16e   :  { %5009 = vmatprep.subr.mxu0 %v5394_v35  ;;  %5005 = vmatpush3.xpose.msk.msra.mxu1 %vm317_vm2, %v545_v57 }
 0x16f   :  { %5002 = vmatmul.mubr.msk.f32.vlgmr.msra.gmra.mxu0 %vm317_vm2, %v5544_v38  ;;  %1912 = vrot.lane.b32.xlu1 %v5610_v51, %s5396_s3 }
 0x170   :  { %1988 = vrot.lane.b32.xlu0 %v5612_v52, %s5396_s3  ;;  %5010 = vmatpush3.xpose.msk.msra.mxu0 %vm317_vm2, %v621_v58 }
 0x171   :  { %5006 = vmatprep.mubr.msk.f32.mxu1 %vm5395_vm1, %v5394_v35  ;;  %5011 = vmatprep.mubr.msk.f32.mxu0 %vm5395_vm1, %v5394_v35  ;;  %v697_v59 = vpop.permute.xlu1 %696 }
 0x172   :  { %5007 = vmatmul.mubr.msk.f32.vlgmr.msra.gmra.mxu1 %vm317_vm2, %v5550_v39  ;;  %5014 = vmatprep.subr.mxu1 %v5394_v35 }
 0x173   :  { %5012 = vmatmul.mubr.msk.f32.vlgmr.msra.gmra.mxu0 %vm317_vm2, %v5552_v40  ;;  %5015 = vmatpush3.xpose.msk.msra.mxu1 %vm317_vm2, %v697_v59 }
 0x174   :  { %2064 = vrot.lane.b32.xlu1 %v5618_v53, %s5396_s3  ;;  %2433 = vrot.lane.b32.xlu0 %v5512_v28, %s5397_s17 }
 0x175   :  { %5016 = vmatprep.mubr.msk.f32.mxu1 %vm5395_vm1, %v5394_v35  ;;  %5019 = vmatprep.subr.mxu0 %v5394_v35 }
 0x176   :  { %5017 = vmatmul.mubr.msk.f32.vlgmr.msra.gmra.mxu1 %vm317_vm2, %v5558_v41  ;;  %5021 = vmatprep.mubr.msk.f32.mxu0 %vm5395_vm1, %v5394_v35 }
 0x177   :  { %5024 = vmatprep.subr.mxu1 %v5394_v35  ;;  %5026 = vmatprep.mubr.msk.f32.mxu1 %vm5395_vm1, %v5394_v35 }
 0x178   :  { %2357 = vrot.lane.b32.xlu1 %v5508_v25, %s5397_s17  ;;  %2585 = vrot.lane.b32.xlu0 %v5520_v32, %s5397_s17 }
 0x17c   :  { %2509 = vrot.lane.b32.xlu1 %v5514_v29, %s5397_s17  ;;  %2737 = vrot.lane.b32.xlu0 %v5524_v34, %s5397_s17 }
 0x180   :  { %2661 = vrot.lane.b32.xlu1 %v5522_v33, %s5397_s17  ;;  %2889 = vrot.lane.b32.xlu0 %v5580_v44, %s5397_s17 }
 0x184   :  { %2813 = vrot.lane.b32.xlu1 %v5574_v42, %s5397_s17  ;;  %3041 = vrot.lane.b32.xlu0 %v5586_v45, %s5397_s17 }
 0x188   :  { %2965 = vrot.lane.b32.xlu1 %v5578_v43, %s5397_s17  ;;  %3269 = vrot.lane.b32.xlu0 %v5532_v36, %s5397_s17 }
 0x18c   :  { %3193 = vrot.lane.b32.xlu1 %v5594_v47, %s5397_s17  ;;  %3421 = vrot.lane.b32.xlu0 %v5544_v38, %s5397_s17 }
 0x190   :  { %3345 = vrot.lane.b32.xlu1 %v5542_v37, %s5397_s17  ;;  %3573 = vrot.lane.b32.xlu0 %v5552_v40, %s5397_s17 }
 0x194   :  { %3497 = vrot.lane.b32.xlu1 %v5550_v39, %s5397_s17  ;;  %3725 = vrot.lane.b32.xlu0 %v5596_v48, %s5397_s17 }
 0x198   :  { %3649 = vrot.lane.b32.xlu1 %v5558_v41, %s5397_s17  ;;  %3877 = vrot.lane.b32.xlu0 %v5604_v50, %s5397_s17 }
 0x19c   :  { %3801 = vrot.lane.b32.xlu1 %v5602_v49, %s5397_s17 }
 0x1a0   :  { %3953 = vrot.lane.b32.xlu1 %v5610_v51, %s5397_s17 }
 0x1a4   :  { %3117 = vrot.lane.b32.xlu1 %v5588_v46, %s5397_s17 }
 0x1c0   :  { %v773_v60 = vpop.permute.xlu0 %772 }
 0x1c1   :  { %5020 = vmatpush3.xpose.msk.msra.mxu0 %vm317_vm2, %v773_v60 }
 0x1c2   :  { %5029 = vmatprep.subr.mxu0 %v5394_v35 }
 0x1c4   :  { %v849_v61 = vpop.permute.xlu1 %848  ;;  %5022 = vmatmul.mubr.msk.f32.vlgmr.msra.gmra.mxu0 %vm317_vm2, %v5596_v48  ;;  %v925_v62 = vpop.permute.xlu0 %924 }
 0x1c5   :  { %5025 = vmatpush3.xpose.msk.msra.mxu1 %vm317_vm2, %v849_v61  ;;  %5030 = vmatpush3.xpose.msk.msra.mxu0 %vm317_vm2, %v925_v62 }
 0x1c6   :  { %5031 = vmatprep.mubr.msk.f32.mxu0 %vm5395_vm1, %v5394_v35  ;;  %5034 = vmatprep.subr.mxu1 %v5394_v35 }
 0x1c7   :  { %5039 = vmatprep.subr.mxu0 %v5394_v35 }
 0x1c8   :  { %5027 = vmatmul.mubr.msk.f32.vlgmr.msra.gmra.mxu1 %vm317_vm2, %v5602_v49  ;;  %v1001_v63 = vpop.permute.xlu1 %1000  ;;  %5032 = vmatmul.mubr.msk.f32.vlgmr.msra.gmra.mxu0 %vm317_vm2, %v5604_v50  ;;  %v1077_v0 = vpop.permute.xlu0 %1076 }
 0x1c9   :  { %5035 = vmatpush3.xpose.msk.msra.mxu1 %vm317_vm2, %v1001_v63  ;;  %5040 = vmatpush3.xpose.msk.msra.mxu0 %vm317_vm2, %v1077_v0 }
 0x1ca   :  { %5036 = vmatprep.mubr.msk.f32.mxu1 %vm5395_vm1, %v5394_v35  ;;  %5041 = vmatprep.mubr.msk.f32.mxu0 %vm5395_vm1, %v5394_v35 }
 0x1cb   :  { %5044 = vmatprep.subr.mxu1 %v5394_v35  ;;  %5049 = vmatprep.subr.mxu0 %v5394_v35 }
 0x1cc   :  { %5037 = vmatmul.mubr.msk.f32.vlgmr.msra.gmra.mxu1 %vm317_vm2, %v5610_v51  ;;  %v1153_v1 = vpop.permute.xlu1 %1152  ;;  %5042 = vmatmul.mubr.msk.f32.vlgmr.msra.gmra.mxu0 %vm317_vm2, %v5612_v52  ;;  %v1229_v2 = vpop.permute.xlu0 %1228 }
 0x1cd   :  { %5045 = vmatpush3.xpose.msk.msra.mxu1 %vm317_vm2, %v1153_v1  ;;  %5050 = vmatpush3.xpose.msk.msra.mxu0 %vm317_vm2, %v1229_v2 }
 0x1ce   :  { %5046 = vmatprep.mubr.msk.f32.mxu1 %vm5395_vm1, %v5394_v35  ;;  %5051 = vmatprep.mubr.msk.f32.mxu0 %vm5395_vm1, %v5394_v35 }
 0x1cf   :  { %5054 = vmatprep.subr.mxu1 %v5394_v35  ;;  %5059 = vmatprep.subr.mxu0 %v5394_v35 }
 0x1d0   :  { %5047 = vmatmul.mubr.msk.f32.vlgmr.msra.gmra.mxu1 %vm317_vm2, %v5618_v53  ;;  %v1305_v3 = vpop.permute.xlu1 %1304  ;;  %5052 = vmatmul.mubr.msk.f32.vlgmr.msra.gmra.mxu0 %vm317_vm2, %v5508_v25  ;;  %v1381_v4 = vpop.permute.xlu0 %1380 }
 0x1d1   :  { %5055 = vmatpush3.xpose.msk.msra.mxu1 %vm317_vm2, %v1305_v3  ;;  %5060 = vmatpush3.xpose.msk.msra.mxu0 %vm317_vm2, %v1381_v4 }
 0x1d2   :  { %5056 = vmatprep.mubr.msk.f32.mxu1 %vm5395_vm1, %v5394_v35  ;;  %5061 = vmatprep.mubr.msk.f32.mxu0 %vm5395_vm1, %v5394_v35 }
 0x1d3   :  { %5064 = vmatprep.subr.mxu1 %v5394_v35  ;;  %5069 = vmatprep.subr.mxu0 %v5394_v35 }
 0x1d4   :  { %5057 = vmatmul.mubr.msk.f32.vlgmr.msra.gmra.mxu1 %vm317_vm2, %v5512_v28  ;;  %v1457_v5 = vpop.permute.xlu1 %1456  ;;  %5062 = vmatmul.mubr.msk.f32.vlgmr.msra.gmra.mxu0 %vm317_vm2, %v5514_v29  ;;  %v1533_v6 = vpop.permute.xlu0 %1532 }
 0x1d5   :  { %5065 = vmatpush3.xpose.msk.msra.mxu1 %vm317_vm2, %v1457_v5  ;;  %5070 = vmatpush3.xpose.msk.msra.mxu0 %vm317_vm2, %v1533_v6 }
 0x1d6   :  { %5066 = vmatprep.mubr.msk.f32.mxu1 %vm5395_vm1, %v5394_v35  ;;  %5071 = vmatprep.mubr.msk.f32.mxu0 %vm5395_vm1, %v5394_v35 }
 0x1d7   :  { %5074 = vmatprep.subr.mxu1 %v5394_v35  ;;  %5079 = vmatprep.subr.mxu0 %v5394_v35 }
 0x1d8   :  { %5067 = vmatmul.mubr.msk.f32.vlgmr.msra.gmra.mxu1 %vm317_vm2, %v5520_v32  ;;  %v1609_v7 = vpop.permute.xlu1 %1608  ;;  %5072 = vmatmul.mubr.msk.f32.vlgmr.msra.gmra.mxu0 %vm317_vm2, %v5522_v33  ;;  %v1685_v8 = vpop.permute.xlu0 %1684 }
 0x1d9   :  { %5075 = vmatpush3.xpose.msk.msra.mxu1 %vm317_vm2, %v1609_v7  ;;  %5080 = vmatpush3.xpose.msk.msra.mxu0 %vm317_vm2, %v1685_v8 }
 0x1da   :  { %5076 = vmatprep.mubr.msk.f32.mxu1 %vm5395_vm1, %v5394_v35  ;;  %5081 = vmatprep.mubr.msk.f32.mxu0 %vm5395_vm1, %v5394_v35 }
 0x1db   :  { %5084 = vmatprep.subr.mxu1 %v5394_v35  ;;  %5089 = vmatprep.subr.mxu0 %v5394_v35 }
 0x1dc   :  { %5077 = vmatmul.mubr.msk.f32.vlgmr.msra.gmra.mxu1 %vm317_vm2, %v5524_v34  ;;  %5082 = vmatmul.mubr.msk.f32.vlgmr.msra.gmra.mxu0 %vm317_vm2, %v5574_v42 }
 0x1dd   :  { %v1761_v9 = vpop.permute.xlu1 %1760  ;;  %v1837_v10 = vpop.permute.xlu0 %1836  ;;  %5086 = vmatprep.mubr.msk.f32.mxu1 %vm5395_vm1, %v5394_v35  ;;  %5091 = vmatprep.mubr.msk.f32.mxu0 %vm5395_vm1, %v5394_v35 }
 0x1de   :  { %5085 = vmatpush3.xpose.msk.msra.mxu1 %vm317_vm2, %v1761_v9  ;;  %5090 = vmatpush3.xpose.msk.msra.mxu0 %vm317_vm2, %v1837_v10 }
 0x1df   :  { %5094 = vmatprep.subr.mxu1 %v5394_v35  ;;  %5099 = vmatprep.subr.mxu0 %v5394_v35 }
 0x1e1   :  { %5087 = vmatmul.mubr.msk.f32.vlgmr.msra.gmra.mxu1 %vm317_vm2, %v5580_v44  ;;  %v1913_v11 = vpop.permute.xlu1 %1912  ;;  %5092 = vmatmul.mubr.msk.f32.vlgmr.msra.gmra.mxu0 %vm317_vm2, %v5578_v43 }
 0x1e2   :  { %v1989_v12 = vpop.permute.xlu0 %1988  ;;  %5095 = vmatpush3.xpose.msk.msra.mxu1 %vm317_vm2, %v1913_v11  ;;  %5096 = vmatprep.mubr.msk.f32.mxu1 %vm5395_vm1, %v5394_v35 }
 0x1e3   :  { %5100 = vmatpush3.xpose.msk.msra.mxu0 %vm317_vm2, %v1989_v12  ;;  %5101 = vmatprep.mubr.msk.f32.mxu0 %vm5395_vm1, %v5394_v35 }
 0x1e4   :  { %5104 = vmatprep.subr.mxu1 %v5394_v35  ;;  %5109 = vmatprep.subr.mxu0 %v5394_v35 }
 0x1e5   :  { %5097 = vmatmul.mubr.msk.f32.vlgmr.msra.gmra.mxu1 %vm317_vm2, %v5586_v45 }
 0x1e6   :  { %v2065_v13 = vpop.permute.xlu1 %2064  ;;  %5102 = vmatmul.mubr.msk.f32.vlgmr.msra.gmra.mxu0 %vm317_vm2, %v5588_v46  ;;  %5106 = vmatprep.mubr.msk.f32.mxu1 %vm5395_vm1, %v5394_v35  ;;  %v2434_v14 = vpop.permute.xlu0 %2433 }
 0x1e7   :  { %5105 = vmatpush3.xpose.msk.msra.mxu1 %vm317_vm2, %v2065_v13  ;;  %5111 = vmatprep.mubr.msk.f32.mxu0 %vm5395_vm1, %v5394_v35 }
 0x1e8   :  { %5114 = vmatprep.subr.mxu1 %v5394_v35 }
 0x1ea   :  { %5107 = vmatmul.mubr.msk.f32.vlgmr.msra.gmra.mxu1 %vm317_vm2, %v5594_v47  ;;  %v2358_v15 = vpop.permute.xlu1 %2357  ;;  %v5852_v37 = vpop.permute.xlu0 %2585 }
 0x1eb   :  { %5110 = vmatpush3.msra.mxu0 %v2358_v15  ;;  %5115 = vmatpush3.msra.mxu1 %v2434_v14 }
 0x1ec   :  { %5119 = vmatprep.subr.mxu0 %v5394_v35  ;;  %5116 = vmatprep.mubr.msk.f32.mxu1 %vm5395_vm1, %v5394_v35 }
 0x1ed   :  { %5124 = vmatprep.subr.mxu1 %v5394_v35 }
 0x1ee   :  { %v5848_v34 = vpop.permute.xlu1 %2509  ;;  %v5860_v42 = vpop.permute.xlu0 %2737 }
 0x1f2   :  { %v5850_v36 = vpop.permute.xlu1 %2661  ;;  %v5876_v54 = vpop.permute.xlu0 %2889 }
 0x1f6   :  { %v5854_v38 = vpop.permute.xlu1 %2813  ;;  %v5892_v2 = vpop.permute.xlu0 %3041 }
 0x1fa   :  { %v5866_v45 = vpop.permute.xlu1 %2965  ;;  %v5908_v12 = vpop.permute.xlu0 %3269 }
 0x1fe   :  { %v5882_v59 = vpop.permute.xlu1 %3193 }
 0x202   :  { %v5898_v5 = vpop.permute.xlu1 %3345 }
 0x22a   :  { %v5824_v16 = vpop.f32.mrf.mxu0 }
 0x22b   :  { %v2141_v17 = vsel %vm2140_vm3, %v5824_v16, -inf }
 0x22c   :  { %2142 = vmax.xlane.f32.xlu0 %v2141_v17  ;;  %v4993_v18 = vpop.f32.mrf.mxu0 }
 0x22d   :  { %v5828_v19 = vpop.f32.mrf.mxu1  ;;  %v5914_v18 = vpop.permute.xlu1 %3497 }
 0x22e   :  { %v2144_v20 = vsel %vm2140_vm3, %v5828_v19, -inf }
 0x22f   :  { %v5832_v21 = vpop.f32.mrf.mxu0  ;;  %v4998_v22 = vpop.f32.mrf.mxu1  ;;  %2145 = vmax.xlane.f32.xlu1 %v2144_v20 }
 0x230   :  { %v2147_v31 = vsel %vm2140_vm3, %v5832_v21, -inf }
 0x231   :  { %v5003_v23 = vpop.f32.mrf.mxu0 }
 0x232   :  { %v5834_v24 = vpop.f32.mrf.mxu1 }
 0x233   :  { %v5836_v25 = vpop.f32.mrf.mxu0  ;;  %v2150_v26 = vsel %vm2140_vm3, %v5834_v24, -inf }
 0x234   :  { %v5008_v27 = vpop.f32.mrf.mxu1  ;;  %2151 = vmax.xlane.f32.xlu0 %v2150_v26  ;;  %v2153_v28 = vsel %vm2140_vm3, %v5836_v25, -inf }
 0x235   :  { %2154 = vmax.xlane.f32.xlu1 %v2153_v28  ;;  %v5013_v29 = vpop.f32.mrf.mxu0 }
 0x236   :  { %v5842_v30 = vpop.f32.mrf.mxu1  ;;  %v5924_v29 = vpop.permute.xlu0 %3421 }
 0x237   :  { %v2156_v33 = vsel %vm2140_vm3, %v5842_v30, -inf }
 0x238   :  { %v5018_v32 = vpop.f32.mrf.mxu1  ;;  %2148 = vmax.xlane.f32.xlu0 %v2147_v31 }
 0x23c   :  { %2157 = vmax.xlane.f32.xlu0 %v2156_v33  ;;  %v5930_v33 = vpop.permute.xlu1 %3649 }
 0x284   :  { %v5856_v39 = vpop.f32.mrf.mxu0 }
 0x285   :  { %v2159_v40 = vsel %vm2140_vm3, %v5856_v39, -inf }
 0x286   :  { %2160 = vmax.xlane.f32.xlu1 %v2159_v40  ;;  %v5023_v41 = vpop.f32.mrf.mxu0 }
 0x288   :  { %v5862_v43 = vpop.f32.mrf.mxu1  ;;  %v5864_v44 = vpop.f32.mrf.mxu0 }
 0x289   :  { %v2162_v46 = vsel %vm2140_vm3, %v5862_v43, -inf  ;;  %v2165_v47 = vsel %vm2140_vm3, %v5864_v44, -inf }
 0x28a   :  { %v5028_v48 = vpop.f32.mrf.mxu1  ;;  %2163 = vmax.xlane.f32.xlu0 %v2162_v46  ;;  %2166 = vmax.xlane.f32.xlu1 %v2165_v47  ;;  %v5033_v49 = vpop.f32.mrf.mxu0 }
 0x28b   :  { %v5936_v48 = vpop.permute.xlu0 %3573 }
 0x28c   :  { %v5872_v50 = vpop.f32.mrf.mxu1  ;;  %v5874_v51 = vpop.f32.mrf.mxu0 }
 0x28d   :  { %v2168_v55 = vsel %vm2140_vm3, %v5872_v50, -inf  ;;  %v2171_v56 = vsel %vm2140_vm3, %v5874_v51, -inf }
 0x28e   :  { %v5038_v57 = vpop.f32.mrf.mxu1  ;;  %2169 = vmax.xlane.f32.xlu0 %v2168_v55  ;;  %2172 = vmax.xlane.f32.xlu1 %v2171_v56  ;;  %v5043_v58 = vpop.f32.mrf.mxu0 }
 0x290   :  { %v5884_v60 = vpop.f32.mrf.mxu1  ;;  %v5886_v61 = vpop.f32.mrf.mxu0 }
 0x291   :  { %v2174_v62 = vsel %vm2140_vm3, %v5884_v60, -inf  ;;  %v2177_v63 = vsel %vm2140_vm3, %v5886_v61, -inf }
 0x292   :  { %v5048_v0 = vpop.f32.mrf.mxu1  ;;  %2175 = vmax.xlane.f32.xlu0 %v2174_v62  ;;  %2178 = vmax.xlane.f32.xlu1 %v2177_v63  ;;  %v5053_v1 = vpop.f32.mrf.mxu0 }
 0x293   :  { %v5946_v62 = vpop.permute.xlu1 %3801  ;;  %v5950_v1 = vpop.permute.xlu0 %3725 }
 0x294   :  { %v5894_v3 = vpop.f32.mrf.mxu1  ;;  %v5896_v4 = vpop.f32.mrf.mxu0 }
 0x295   :  { %v2180_v6 = vsel %vm2140_vm3, %v5894_v3, -inf  ;;  %v2183_v7 = vsel %vm2140_vm3, %v5896_v4, -inf }
 0x296   :  { %v5058_v8 = vpop.f32.mrf.mxu1  ;;  %2181 = vmax.xlane.f32.xlu0 %v2180_v6  ;;  %2184 = vmax.xlane.f32.xlu1 %v2183_v7  ;;  %v5063_v9 = vpop.f32.mrf.mxu0 }
 0x297   :  { %v5954_v8 = vpop.permute.xlu1 %3953  ;;  %v5956_v9 = vpop.permute.xlu0 %3877 }
 0x298   :  { %v5904_v10 = vpop.f32.mrf.mxu1  ;;  %v5906_v11 = vpop.f32.mrf.mxu0 }
 0x299   :  { %v2186_v13 = vsel %vm2140_vm3, %v5904_v10, -inf  ;;  %v2189_v14 = vsel %vm2140_vm3, %v5906_v11, -inf }
 0x29a   :  { %v5068_v15 = vpop.f32.mrf.mxu1  ;;  %2187 = vmax.xlane.f32.xlu0 %v2186_v13  ;;  %2190 = vmax.xlane.f32.xlu1 %v2189_v14  ;;  %v5073_v17 = vpop.f32.mrf.mxu0 }
 0x29b   :  { %v5958_v13 = vpop.permute.xlu1 %3117 }
 0x29c   :  { %v5916_v20 = vpop.f32.mrf.mxu1  ;;  %v5918_v22 = vpop.f32.mrf.mxu0 }
 0x29d   :  { %v2192_v23 = vsel %vm2140_vm3, %v5916_v20, -inf  ;;  %v2195_v26 = vsel %vm2140_vm3, %v5918_v22, -inf }
 0x29e   :  { %v5078_v27 = vpop.f32.mrf.mxu1  ;;  %2193 = vmax.xlane.f32.xlu0 %v2192_v23  ;;  %2196 = vmax.xlane.f32.xlu1 %v2195_v26  ;;  %v5083_v28 = vpop.f32.mrf.mxu0 }
 0x2a1   :  { %v5926_v31 = vpop.f32.mrf.mxu1  ;;  %v5928_v32 = vpop.f32.mrf.mxu0 }
 0x2a2   :  { %v2198_v40 = vsel %vm2140_vm3, %v5926_v31, -inf  ;;  %v2201_v41 = vsel %vm2140_vm3, %v5928_v32, -inf }
 0x2a3   :  { %v5088_v46 = vpop.f32.mrf.mxu1  ;;  %2199 = vmax.xlane.f32.xlu0 %v2198_v40  ;;  %2202 = vmax.xlane.f32.xlu1 %v2201_v41  ;;  %v5093_v47 = vpop.f32.mrf.mxu0 }
 0x2a5   :  { %v5938_v49 = vpop.f32.mrf.mxu1 }
 0x2a6   :  { %v5940_v55 = vpop.f32.mrf.mxu0  ;;  %v2204_v56 = vsel %vm2140_vm3, %v5938_v49, -inf }
 0x2a7   :  { %v5098_v57 = vpop.f32.mrf.mxu1  ;;  %2205 = vmax.xlane.f32.xlu0 %v2204_v56  ;;  %v2207_v58 = vsel %vm2140_vm3, %v5940_v55, -inf }
 0x2a8   :  { %2208 = vmax.xlane.f32.xlu1 %v2207_v58  ;;  %v5103_v63 = vpop.f32.mrf.mxu0 }
 0x2aa   :  { %v5948_v0 = vpop.f32.mrf.mxu1 }
 0x2ab   :  { %v2210_v6 = vsel %vm2140_vm3, %v5948_v0, -inf }
 0x2ac   :  { %v5108_v7 = vpop.f32.mrf.mxu1  ;;  %2211 = vmax.xlane.f32.xlu0 %v2210_v6 }
 0x2b5   :  { %v2143_v14 = vpop.xlane.xlu0 %2142 }
 0x2b6   :  { %v2213_v15 = vsub.f32 %v5824_v16, %v2143_v14 }
 0x2b8   :  { %v2237_v17 = vmul.f32 1.442695, %v2213_v15  ;;  %v2146_v23 = vpop.xlane.xlu1 %2145 }
 0x2b9   :  { %4105 = vrot.lane.b32.xlu1 %v5618_v53, %s5397_s17  ;;  %v2214_v26 = vsub.f32 %v5828_v19, %v2146_v23 }
 0x2ba   :  { %5261 = vpow2.f32 %v2237_v17 }
 0x2bb   :  { %v2239_v27 = vmul.f32 1.442695, %v2214_v26 }
 0x2bd   :  { %5263 = vpow2.f32 %v2239_v27  ;;  %v2152_v28 = vpop.xlane.xlu0 %2151 }
 0x2be   :  { %v2155_v40 = vpop.xlane.xlu1 %2154  ;;  %v2216_v41 = vsub.f32 %v5834_v24, %v2152_v28 }
 0x2bf   :  { %v2217_v47 = vsub.f32 %v5836_v25, %v2155_v40 }
 0x2c0   :  { %v2243_v46 = vmul.f32 1.442695, %v2216_v41 }
 0x2c1   :  { %v2149_v56 = vpop.xlane.xlu0 %2148  ;;  %v2245_v57 = vmul.f32 1.442695, %v2217_v47 }
 0x2c2   :  { %5265 = vpow2.f32 %v2243_v46  ;;  %4029 = vrot.lane.b32.xlu0 %v5612_v52, %s5397_s17  ;;  %v2215_v16 = vsub.f32 %v5832_v21, %v2149_v56 }
 0x2c4   :  { %v2241_v53 = vmul.f32 1.442695, %v2215_v16 }
 0x2c5   :  { %v2158_v19 = vpop.xlane.xlu0 %2157 }
 0x2c6   :  { %5267 = vpow2.f32 %v2241_v53  ;;  %v2218_v58 = vsub.f32 %v5842_v30, %v2158_v19 }
 0x2c7   :  { %v5970_v63 = vpop.eup %5261  ;;  %5269 = vpow2.f32 %v2245_v57 }
 0x2c8   :  { %v2247_v6 = vmul.f32 1.442695, %v2218_v58  ;;  %5112 = vmatmul.mubr.msk.f32.vlgmr.msra.gmra.mxu0 %vm2140_vm3, %v5970_v63 }
 0x2c9   :  { %5120 = vmatpush3.msra.mxu0 %v5848_v34  ;;  %5121 = vmatprep.mubr.msk.f32.mxu0 %vm5395_vm1, %v5394_v35 }
 0x2ca   :  { %v5977_v52 = vpop.eup %5263  ;;  %5271 = vpow2.f32 %v2247_v6  ;;  %5129 = vmatprep.subr.mxu0 %v5394_v35 }
 0x2cb   :  { %5117 = vmatmul.mubr.msk.f32.vlgmr.msra.gmra.mxu1 %vm2140_vm3, %v5977_v52 }
 0x2cc   :  { %5125 = vmatpush3.msra.mxu1 %v5852_v37  ;;  %5126 = vmatprep.mubr.msk.f32.mxu1 %vm5395_vm1, %v5394_v35 }
 0x2cd   :  { %5134 = vmatprep.subr.mxu1 %v5394_v35 }
 0x2cf   :  { %v5986_v21 = vpop.eup %5265 }
 0x2d0   :  { %5127 = vmatmul.mubr.msk.f32.vlgmr.msra.gmra.mxu1 %vm2140_vm3, %v5986_v21 }
 0x2d1   :  { %5135 = vmatpush3.msra.mxu1 %v5860_v42  ;;  %5136 = vmatprep.mubr.msk.f32.mxu1 %vm5395_vm1, %v5394_v35 }
 0x2d2   :  { %5144 = vmatprep.subr.mxu1 %v5394_v35 }
 0x2d3   :  { %v5994_v24 = vpop.eup %5267 }
 0x2d4   :  { %5122 = vmatmul.mubr.msk.f32.vlgmr.msra.gmra.mxu0 %vm2140_vm3, %v5994_v24  ;;  %v6001_v25 = vpop.eup %5269 }
 0x2d5   :  { %5130 = vmatpush3.msra.mxu0 %v5850_v36  ;;  %5131 = vmatprep.mubr.msk.f32.mxu0 %vm5395_vm1, %v5394_v35 }
 0x2d6   :  { %5139 = vmatprep.subr.mxu0 %v5394_v35 }
 0x2d7   :  { %v6004_v30 = vpop.eup %5271 }
 0x2d8   :  { %5132 = vmatmul.mubr.msk.f32.vlgmr.msra.gmra.mxu0 %vm2140_vm3, %v6001_v25  ;;  %5137 = vmatmul.mubr.msk.f32.vlgmr.msra.gmra.mxu1 %vm2140_vm3, %v6004_v30 }
 0x2d9   :  { %5140 = vmatpush3.msra.mxu0 %v5854_v38  ;;  %5145 = vmatpush3.msra.mxu1 %v5876_v54 }
 0x2da   :  { %5141 = vmatprep.mubr.msk.f32.mxu0 %vm5395_vm1, %v5394_v35  ;;  %5149 = vmatprep.subr.mxu0 %v5394_v35 }
 0x2db   :  { %5146 = vmatprep.mubr.msk.f32.mxu1 %vm5395_vm1, %v5394_v35  ;;  %5154 = vmatprep.subr.mxu1 %v5394_v35 }
 0x30f   :  { %v2161_v34 = vpop.xlane.xlu1 %2160 }
 0x310   :  { %v2219_v36 = vsub.f32 %v5856_v39, %v2161_v34 }
 0x312   :  { %v2249_v37 = vmul.f32 1.442695, %v2219_v36 }
 0x313   :  { %v2167_v42 = vpop.xlane.xlu1 %2166  ;;  %v2164_v7 = vpop.xlane.xlu0 %2163 }
 0x314   :  { %5273 = vpow2.f32 %v2249_v37  ;;  %v2221_v38 = vsub.f32 %v5864_v44, %v2167_v42  ;;  %v2220_v54 = vsub.f32 %v5862_v43, %v2164_v7 }
 0x316   :  { %v2253_v14 = vmul.f32 1.442695, %v2221_v38  ;;  %v2251_v15 = vmul.f32 1.442695, %v2220_v54 }
 0x317   :  { %v2173_v17 = vpop.xlane.xlu1 %2172  ;;  %v2170_v23 = vpop.xlane.xlu0 %2169 }
 0x318   :  { %5275 = vpow2.f32 %v2253_v14  ;;  %v2223_v26 = vsub.f32 %v5874_v51, %v2173_v17  ;;  %v2222_v27 = vsub.f32 %v5872_v50, %v2170_v23 }
 0x319   :  { %5277 = vpow2.f32 %v2251_v15 }
 0x31a   :  { %v2257_v28 = vmul.f32 1.442695, %v2223_v26  ;;  %v2255_v39 = vmul.f32 1.442695, %v2222_v27 }
 0x31b   :  { %v2179_v40 = vpop.xlane.xlu1 %2178  ;;  %v2176_v41 = vpop.xlane.xlu0 %2175 }
 0x31c   :  { %5279 = vpow2.f32 %v2257_v28  ;;  %v2225_v46 = vsub.f32 %v5886_v61, %v2179_v40  ;;  %v2224_v44 = vsub.f32 %v5884_v60, %v2176_v41 }
 0x31d   :  { %5281 = vpow2.f32 %v2255_v39 }
 0x31e   :  { %v2261_v43 = vmul.f32 1.442695, %v2225_v46  ;;  %v2259_v47 = vmul.f32 1.442695, %v2224_v44 }
 0x31f   :  { %v2185_v56 = vpop.xlane.xlu1 %2184  ;;  %v2182_v16 = vpop.xlane.xlu0 %2181 }
 0x320   :  { %5283 = vpow2.f32 %v2261_v43  ;;  %v2227_v51 = vsub.f32 %v5896_v4, %v2185_v56  ;;  %v2226_v50 = vsub.f32 %v5894_v3, %v2182_v16 }
 0x321   :  { %v6027_v53 = vpop.eup %5273  ;;  %5285 = vpow2.f32 %v2259_v47 }
 0x322   :  { %v2265_v57 = vmul.f32 1.442695, %v2227_v51  ;;  %v2263_v19 = vmul.f32 1.442695, %v2226_v50  ;;  %5142 = vmatmul.mubr.msk.f32.vlgmr.msra.gmra.mxu0 %vm2140_vm3, %v6027_v53 }
 0x323   :  { %5150 = vmatpush3.msra.mxu0 %v5866_v45  ;;  %v2191_v60 = vpop.xlane.xlu1 %2190  ;;  %v2188_v61 = vpop.xlane.xlu0 %2187  ;;  %5151 = vmatprep.mubr.msk.f32.mxu0 %vm5395_vm1, %v5394_v35 }
 0x324   :  { %5287 = vpow2.f32 %v2265_v57  ;;  %v2229_v4 = vsub.f32 %v5906_v11, %v2191_v60  ;;  %v2228_v3 = vsub.f32 %v5904_v10, %v2188_v61  ;;  %5159 = vmatprep.subr.mxu0 %v5394_v35 }
 0x325   :  { %v6037_v58 = vpop.eup %5275  ;;  %5289 = vpow2.f32 %v2263_v19 }
 0x326   :  { %v6039_v6 = vpop.eup %5277  ;;  %v2269_v34 = vmul.f32 1.442695, %v2229_v4  ;;  %v2267_v36 = vmul.f32 1.442695, %v2228_v3  ;;  %5152 = vmatmul.mubr.msk.f32.vlgmr.msra.gmra.mxu0 %vm2140_vm3, %v6037_v58  ;;  %v2309_v57 = vsel %vm2140_vm3, %v6037_v58, 0.0 }
 0x327   :  { %5147 = vmatmul.mubr.msk.f32.vlgmr.msra.gmra.mxu1 %vm2140_vm3, %v6039_v6  ;;  %5160 = vmatpush3.msra.mxu0 %v5958_v13  ;;  %v2197_v45 = vpop.xlane.xlu1 %2196  ;;  %v2194_v11 = vpop.xlane.xlu0 %2193 }
 0x328   :  { %5291 = vpow2.f32 %v2269_v34  ;;  %5155 = vmatpush3.msra.mxu1 %v5892_v2  ;;  %v2231_v10 = vsub.f32 %v5918_v22, %v2197_v45  ;;  %v2230_v37 = vsub.f32 %v5916_v20, %v2194_v11  ;;  %5156 = vmatprep.mubr.msk.f32.mxu1 %vm5395_vm1, %v5394_v35  ;;  %v2288_v34 = vsel %vm2140_vm3, %v5977_v52, 0.0 }
 0x329   :  { %v6051_v42 = vpop.eup %5279  ;;  %5293 = vpow2.f32 %v2267_v36  ;;  %5161 = vmatprep.mubr.msk.f32.mxu0 %vm5395_vm1, %v5394_v35  ;;  %5164 = vmatprep.subr.mxu1 %v5394_v35  ;;  %v2285_v36 = vsel %vm2140_vm3, %v5970_v63, 0.0  ;;  %v2291_v45 = vsel %vm2140_vm3, %v5994_v24, 0.0  ;;  %v2294_v11 = vsel %vm2140_vm3, %v5986_v21, 0.0 }
 0x32a   :  { %v6056_v13 = vpop.eup %5281  ;;  %v2273_v7 = vmul.f32 1.442695, %v2231_v10  ;;  %v2271_v38 = vmul.f32 1.442695, %v2230_v37  ;;  %5169 = vmatprep.subr.mxu0 %v5394_v35  ;;  %5162 = vmatmul.mubr.msk.f32.vlgmr.msra.gmra.mxu0 %vm2140_vm3, %v6051_v42  ;;  %v2315_v4 = vsel %vm2140_vm3, %v6051_v42, 0.0 }
 0x32b   :  { %5157 = vmatmul.mubr.msk.f32.vlgmr.msra.gmra.mxu1 %vm2140_vm3, %v6056_v13  ;;  %5170 = vmatpush3.msra.mxu0 %v5908_v12  ;;  %v2312_v60 = vsel %vm2140_vm3, %v6056_v13, 0.0 }
 0x32c   :  { %5295 = vpow2.f32 %v2273_v7  ;;  %5165 = vmatpush3.msra.mxu1 %v5882_v59  ;;  %v2203_v2 = vpop.xlane.xlu1 %2202  ;;  %v2200_v20 = vpop.xlane.xlu0 %2199  ;;  %5166 = vmatprep.mubr.msk.f32.mxu1 %vm5395_vm1, %v5394_v35 }
 0x32d   :  { %v6067_v22 = vpop.eup %5283  ;;  %5297 = vpow2.f32 %v2271_v38  ;;  %v2233_v54 = vsub.f32 %v5928_v32, %v2203_v2  ;;  %v2232_v14 = vsub.f32 %v5926_v31, %v2200_v20  ;;  %5171 = vmatprep.mubr.msk.f32.mxu0 %vm5395_vm1, %v5394_v35  ;;  %5174 = vmatprep.subr.mxu1 %v5394_v35 }
 0x32e   :  { %v6074_v12 = vpop.eup %5285  ;;  %5179 = vmatprep.subr.mxu0 %v5394_v35  ;;  %5172 = vmatmul.mubr.msk.f32.vlgmr.msra.gmra.mxu0 %vm2140_vm3, %v6067_v22  ;;  %v2321_v50 = vsel %vm2140_vm3, %v6067_v22, 0.0 }
 0x32f   :  { %v2277_v59 = vmul.f32 1.442695, %v2233_v54  ;;  %v2275_v15 = vmul.f32 1.442695, %v2232_v14  ;;  %5167 = vmatmul.mubr.msk.f32.vlgmr.msra.gmra.mxu1 %vm2140_vm3, %v6074_v12  ;;  %5180 = vmatpush3.msra.mxu0 %v5924_v29  ;;  %v2318_v58 = vsel %vm2140_vm3, %v6074_v12, 0.0 }
 0x330   :  { %5175 = vmatpush3.msra.mxu1 %v5898_v5  ;;  %v2206_v31 = vpop.xlane.xlu0 %2205  ;;  %5176 = vmatprep.mubr.msk.f32.mxu1 %vm5395_vm1, %v5394_v35 }
 0x331   :  { %v6085_v32 = vpop.eup %5287  ;;  %5299 = vpow2.f32 %v2277_v59  ;;  %v2209_v17 = vpop.xlane.xlu1 %2208  ;;  %v2234_v23 = vsub.f32 %v5938_v49, %v2206_v31  ;;  %5181 = vmatprep.mubr.msk.f32.mxu0 %vm5395_vm1, %v5394_v35  ;;  %5184 = vmatprep.subr.mxu1 %v5394_v35 }
 0x332   :  { %v6091_v26 = vpop.eup %5289  ;;  %5301 = vpow2.f32 %v2275_v15  ;;  %v2235_v5 = vsub.f32 %v5940_v55, %v2209_v17  ;;  %5189 = vmatprep.subr.mxu0 %v5394_v35  ;;  %5182 = vmatmul.mubr.msk.f32.vlgmr.msra.gmra.mxu0 %vm2140_vm3, %v6085_v32  ;;  %v2327_v19 = vsel %vm2140_vm3, %v6085_v32, 0.0 }
 0x333   :  { %v2279_v29 = vmul.f32 1.442695, %v2234_v23  ;;  %5177 = vmatmul.mubr.msk.f32.vlgmr.msra.gmra.mxu1 %vm2140_vm3, %v6091_v26  ;;  %5190 = vmatpush3.msra.mxu0 %v5936_v48 }
 0x334   :  { %v2281_v49 = vmul.f32 1.442695, %v2235_v5  ;;  %5185 = vmatpush3.msra.mxu1 %v5914_v18  ;;  %5186 = vmatprep.mubr.msk.f32.mxu1 %vm5395_vm1, %v5394_v35 }
 0x335   :  { %v6103_v27 = vpop.eup %5291  ;;  %5303 = vpow2.f32 %v2279_v29  ;;  %v2212_v55 = vpop.xlane.xlu0 %2211  ;;  %5191 = vmatprep.mubr.msk.f32.mxu0 %vm5395_vm1, %v5394_v35  ;;  %5194 = vmatprep.subr.mxu1 %v5394_v35 }
 0x336   :  { %v6108_v28 = vpop.eup %5293  ;;  %5305 = vpow2.f32 %v2281_v49  ;;  %v2236_v48 = vsub.f32 %v5948_v0, %v2212_v55  ;;  %5199 = vmatprep.subr.mxu0 %v5394_v35  ;;  %5192 = vmatmul.mubr.msk.f32.vlgmr.msra.gmra.mxu0 %vm2140_vm3, %v6103_v27  ;;  %v4106_v47 = vpop.permute.xlu1 %4105  ;;  %v2333_v3 = vsel %vm2140_vm3, %v6103_v27, 0.0 }
 0x337   :  { %5187 = vmatmul.mubr.msk.f32.vlgmr.msra.gmra.mxu1 %vm2140_vm3, %v6108_v28  ;;  %5200 = vmatpush3.msra.mxu0 %v5950_v1  ;;  %v2330_v61 = vsel %vm2140_vm3, %v6108_v28, 0.0 }
 0x338   :  { %v2283_v18 = vmul.f32 1.442695, %v2236_v48  ;;  %5195 = vmatpush3.msra.mxu1 %v5930_v33  ;;  %5196 = vmatprep.mubr.msk.f32.mxu1 %vm5395_vm1, %v5394_v35 }
 0x339   :  { %v5296_v39 = vpop.eup %5295  ;;  %5201 = vmatprep.mubr.msk.f32.mxu0 %vm5395_vm1, %v5394_v35  ;;  %5204 = vmatprep.subr.mxu1 %v5394_v35  ;;  %v4030_v41 = vpop.permute.xlu0 %4029 }
 0x33a   :  { %v6123_v0 = vpop.eup %5297  ;;  %5307 = vpow2.f32 %v2283_v18  ;;  %5209 = vmatprep.subr.mxu0 %v5394_v35  ;;  %5202 = vmatmul.mubr.msk.f32.vlgmr.msra.gmra.mxu0 %vm2140_vm3, %v5296_v39  ;;  %v2339_v1 = vsel %vm2140_vm3, %v5296_v39, 0.0 }
 0x33b   :  { %5197 = vmatmul.mubr.msk.f32.vlgmr.msra.gmra.mxu1 %vm2140_vm3, %v6123_v0  ;;  %5210 = vmatpush3.msra.mxu0 %v5956_v9 }
 0x33c   :  { %5205 = vmatpush3.msra.mxu1 %v5946_v62  ;;  %2340 = vadd.xlane.f32.xlu0 %v2339_v1 }
 0x33d   :  { %5206 = vmatprep.mubr.msk.f32.mxu1 %vm5395_vm1, %v5394_v35  ;;  %5211 = vmatprep.mubr.msk.f32.mxu0 %vm5395_vm1, %v5394_v35 }
 0x33e   :  { %v5300_v33 = vpop.eup %5299  ;;  %5214 = vmatprep.subr.mxu1 %v5394_v35  ;;  %5219 = vmatprep.subr.mxu0 %v5394_v35 }
 0x33f   :  { %v5302_v40 = vpop.eup %5301  ;;  %5212 = vmatmul.mubr.msk.f32.vlgmr.msra.gmra.mxu0 %vm2140_vm3, %v5300_v33  ;;  %v2345_v9 = vsel %vm2140_vm3, %v5300_v33, 0.0 }
 0x340   :  { %5207 = vmatmul.mubr.msk.f32.vlgmr.msra.gmra.mxu1 %vm2140_vm3, %v5302_v40  ;;  %5220 = vmatpush3.msra.mxu0 %v4030_v41  ;;  %v2342_v62 = vsel %vm2140_vm3, %v5302_v40, 0.0 }
 0x341   :  { %5215 = vmatpush3.msra.mxu1 %v5954_v8  ;;  %2346 = vadd.xlane.f32.xlu0 %v2345_v9  ;;  %v2303_v8 = vsel %vm2140_vm3, %v6027_v53, 0.0  ;;  %v2306_v53 = vsel %vm2140_vm3, %v6039_v6, 0.0  ;;  %v2336_v6 = vsel %vm2140_vm3, %v6123_v0, 0.0 }
 0x342   :  { %v5304_v46 = vpop.eup %5303  ;;  %2343 = vadd.xlane.f32.xlu1 %v2342_v62  ;;  %5216 = vmatprep.mubr.msk.f32.mxu1 %vm5395_vm1, %v5394_v35 }
 0x343   :  { %v5306_v44 = vpop.eup %5305  ;;  %5221 = vmatprep.mubr.msk.f32.mxu0 %vm5395_vm1, %v5394_v35  ;;  %5224 = vmatprep.subr.mxu1 %v5394_v35  ;;  %v2348_v43 = vsel %vm2140_vm3, %v5304_v46, 0.0 }
 0x344   :  { %5217 = vmatmul.mubr.msk.f32.vlgmr.msra.gmra.mxu1 %vm2140_vm3, %v5304_v46  ;;  %5222 = vmatmul.mubr.msk.f32.vlgmr.msra.gmra.mxu0 %vm2140_vm3, %v5306_v44  ;;  %v2351_v51 = vsel %vm2140_vm3, %v5306_v44, 0.0 }
 0x345   :  { %5225 = vmatpush3.msra.mxu1 %v4106_v47  ;;  %2349 = vadd.xlane.f32.xlu0 %v2348_v43 }
 0x346   :  { %2304 = vadd.xlane.f32.xlu1 %v2303_v8  ;;  %5226 = vmatprep.mubr.msk.f32.mxu1 %vm5395_vm1, %v5394_v35  ;;  %v2324_v35 = vsel %vm2140_vm3, %v6091_v26, 0.0 }
 0x347   :  { %v5308_v56 = vpop.eup %5307 }
 0x348   :  { %5227 = vmatmul.mubr.msk.f32.vlgmr.msra.gmra.mxu1 %vm2140_vm3, %v5308_v56  ;;  %v2354_v16 = vsel %vm2140_vm3, %v5308_v56, 0.0 }
 0x349   :  { %2355 = vadd.xlane.f32.xlu0 %v2354_v16 }
 0x34a   :  { %2352 = vadd.xlane.f32.xlu1 %v2351_v51 }
 0x34d   :  { %2322 = vadd.xlane.f32.xlu0 %v2321_v50 }
 0x34e   :  { %2307 = vadd.xlane.f32.xlu1 %v2306_v53 }
 0x351   :  { %2325 = vadd.xlane.f32.xlu0 %v2324_v35 }
 0x352   :  { %2310 = vadd.xlane.f32.xlu1 %v2309_v57 }
 0x355   :  { %2328 = vadd.xlane.f32.xlu0 %v2327_v19 }
 0x356   :  { %2313 = vadd.xlane.f32.xlu1 %v2312_v60 }
 0x359   :  { %2331 = vadd.xlane.f32.xlu0 %v2330_v61 }
 0x35a   :  { %2316 = vadd.xlane.f32.xlu1 %v2315_v4 }
 0x35d   :  { %2334 = vadd.xlane.f32.xlu0 %v2333_v3 }
 0x35e   :  { %2319 = vadd.xlane.f32.xlu1 %v2318_v58 }
 0x361   :  { %2337 = vadd.xlane.f32.xlu0 %v2336_v6 }
 0x362   :  { %2289 = vadd.xlane.f32.xlu1 %v2288_v34 }
 0x365   :  { %2286 = vadd.xlane.f32.xlu0 %v2285_v36 }
 0x369   :  { %2292 = vadd.xlane.f32.xlu0 %v2291_v45 }
 0x36d   :  { %2295 = vadd.xlane.f32.xlu0 %v2294_v11 }
 0x388   :  { %v6188_v10 = vpop.f32.mrf.mxu0 }
 0x38a   :  { %v5113_v37 = vpop.f32.mrf.mxu0 }
 0x38b   :  { %v6190_v42 = vpop.f32.mrf.mxu1 }
 0x38d   :  { %v5118_v52 = vpop.f32.mrf.mxu1 }
 0x390   :  { %v6192_v13 = vpop.f32.mrf.mxu1 }
 0x392   :  { %v5128_v7 = vpop.f32.mrf.mxu1 }
 0x394   :  { %v6194_v38 = vpop.f32.mrf.mxu0 }
 0x396   :  { %v5123_v63 = vpop.f32.mrf.mxu0 }
 0x398   :  { %v6196_v2 = vpop.f32.mrf.mxu0  ;;  %v6198_v24 = vpop.f32.mrf.mxu1 }
 0x39a   :  { %v5133_v20 = vpop.f32.mrf.mxu0  ;;  %v5138_v22 = vpop.f32.mrf.mxu1 }
 0x3c5   :  { %v2341_v32 = vpop.xlane.xlu0 %2340 }
 0x3ca   :  { %v2347_v27 = vpop.xlane.xlu0 %2346 }
 0x3cb   :  { %v2344_v21 = vpop.xlane.xlu1 %2343 }
 0x3ce   :  { %v2350_v1 = vpop.xlane.xlu0 %2349 }
 0x3cf   :  { %v2305_v54 = vpop.xlane.xlu1 %2304 }
 0x3d0   :  { %5309 = vrcp.f32 %v2305_v54 }
 0x3d1   :  { %5311 = vrcp.f32 %v2341_v32 }
 0x3d2   :  { %5313 = vrcp.f32 %v2344_v21  ;;  %v2356_v51 = vpop.xlane.xlu0 %2355 }
 0x3d3   :  { %v2353_v40 = vpop.xlane.xlu1 %2352  ;;  %5315 = vrcp.f32 %v2350_v1 }
 0x3d4   :  { %5317 = vrcp.f32 %v2353_v40 }
 0x3d5   :  { %5319 = vrcp.f32 %v2347_v27 }
 0x3d6   :  { %5321 = vrcp.f32 %v2356_v51  ;;  %v4320_v51 = vld [vmem:[%s6515_s4 + $0x8] sm:$0xff] }
 0x3d7   :  { %v2308_v54 = vpop.xlane.xlu1 %2307 }
 0x3d8   :  { %5323 = vrcp.f32 %v2308_v54 }
 0x3dd   :  { %v5310_v14 = vpop.eup %5309 }
 0x3de   :  { %v5312_v47 = vpop.eup %5311 }
 0x3df   :  { %v5314_v57 = vpop.eup %5313 }
 0x3e0   :  { %v5316_v3 = vpop.eup %5315 }
 0x3e1   :  { %v5318_v58 = vpop.eup %5317 }
 0x3e2   :  { %v2885_v12 = vpop.f32.mrf.mxu0  ;;  %v5320_v52 = vpop.eup %5319 }
 0x3e3   :  { %v6200_v59 = vmul.f32 %v5310_v14, %v2885_v12  ;;  %v5322_v22 = vpop.eup %5321  ;;  %v2311_v14 = vpop.xlane.xlu1 %2310  ;;  %v2300_v12 = vsel %vm2140_vm3, %v6004_v30, 0.0 }
 0x3e4   :  { %v5143_v15 = vpop.f32.mrf.mxu0  ;;  %5325 = vrcp.f32 %v2311_v14 }
 0x3e6   :  { %v6202_v31 = vpop.f32.mrf.mxu0 }
 0x3e7   :  { %v6204_v17 = vpop.f32.mrf.mxu1  ;;  %v2314_v15 = vpop.xlane.xlu1 %2313 }
 0x3e8   :  { %v5153_v23 = vpop.f32.mrf.mxu0 }
 0x3e9   :  { %v5148_v26 = vpop.f32.mrf.mxu1  ;;  %v2297_v23 = vsel %vm2140_vm3, %v6001_v25, 0.0 }
 0x3ea   :  { %v6206_v5 = vpop.f32.mrf.mxu0  ;;  %v5324_v26 = vpop.eup %5323 }
 0x3eb   :  { %v6208_v29 = vpop.f32.mrf.mxu1  ;;  %v2317_v32 = vpop.xlane.xlu1 %2316 }
 0x3ec   :  { %v5163_v49 = vpop.f32.mrf.mxu0  ;;  %5327 = vrcp.f32 %v2317_v32 }
 0x3ed   :  { %v5158_v55 = vpop.f32.mrf.mxu1  ;;  %5329 = vrcp.f32 %v2314_v15  ;;  %v4212_v49 = vmul.f32 %v5324_v26, %v6204_v17  ;;  %v4326_v17 = vld [vmem:[%s6515_s4 + $0x38] sm:$0xff] }
 0x3ee   :  { %v6210_v28 = vpop.f32.mrf.mxu0  ;;  %5229 = vmatprep.subr.mxu0 %v4326_v17 }
 0x3ef   :  { %v6212_v48 = vpop.f32.mrf.mxu1  ;;  %5230 = vmatpush3.msra.mxu0 %v4326_v17 }
 0x3f0   :  { %v5173_v18 = vpop.f32.mrf.mxu0 }
 0x3f1   :  { %v5168_v39 = vpop.f32.mrf.mxu1  ;;  %v5326_v27 = vpop.eup %5325 }
 0x3f2   :  { %v6214_v0 = vpop.f32.mrf.mxu0  ;;  %v4213_v55 = vmul.f32 %v5326_v27, %v6202_v31  ;;  %v2323_v18 = vpop.xlane.xlu0 %2322  ;;  %v4325_v31 = vld [vmem:[%s6515_s4 + $0x30] sm:$0xff] }
 0x3f3   :  { %v6216_v33 = vpop.f32.mrf.mxu1  ;;  %5231 = vmatprep.subr.mxu0 %v4325_v31 }
 0x3f4   :  { %v5183_v41 = vpop.f32.mrf.mxu0  ;;  %5232 = vmatpush3.msra.mxu0 %v4325_v31 }
 0x3f5   :  { %v5178_v9 = vpop.f32.mrf.mxu1 }
 0x3f6   :  { %v6218_v62 = vpop.f32.mrf.mxu0  ;;  %v2326_v40 = vpop.xlane.xlu0 %2325 }
 0x3f7   :  { %v6220_v46 = vpop.f32.mrf.mxu1  ;;  %5331 = vrcp.f32 %v2326_v40 }
 0x3f8   :  { %v5193_v44 = vpop.f32.mrf.mxu0  ;;  %5333 = vrcp.f32 %v2323_v18 }
 0x3f9   :  { %v5188_v43 = vpop.f32.mrf.mxu1  ;;  %v5328_v30 = vpop.eup %5327 }
 0x3fa   :  { %v3797_v8 = vpop.f32.mrf.mxu0  ;;  %v4215_v39 = vmul.f32 %v5328_v30, %v6206_v5  ;;  %v5330_v1 = vpop.eup %5329  ;;  %v4324_v5 = vld [vmem:[%s6515_s4 + $0x28] sm:$0xff] }
 0x3fb   :  { %v6222_v56 = vpop.f32.mrf.mxu1  ;;  %v4223_v16 = vmul.f32 %v5312_v47, %v3797_v8  ;;  %v4214_v25 = vmul.f32 %v5330_v1, %v6208_v29  ;;  %5233 = vmatprep.subr.mxu0 %v4324_v5  ;;  %v4322_v29 = vld [vmem:[%s6515_s4 + $0x18] sm:$0xff]  ;;  %v2329_v41 = vpop.xlane.xlu0 %2328 }
 0x3fc   :  { %v5203_v50 = vpop.f32.mrf.mxu0  ;;  %5234 = vmatpush3.msra.mxu0 %v4324_v5  ;;  %v2320_v8 = vpop.xlane.xlu1 %2319 }
 0x3fd   :  { %v5198_v53 = vpop.f32.mrf.mxu1  ;;  %4265 = vrot.lane.b32.xlu1 %v4223_v16, %s5398_s18  ;;  %v4321_v16 = vld [vmem:[%s6515_s4 + $0x10] sm:$0xff]  ;;  %5335 = vrcp.f32 %v2320_v8 }
 0x3fe   :  { %5337 = vrcp.f32 %v2329_v41  ;;  %v4319_v53 = vld [vmem:[%s6515_s4] sm:$0xff] }
 0x3ff   :  { %v3949_v35 = vpop.f32.mrf.mxu0  ;;  %v2332_v9 = vpop.xlane.xlu0 %2331 }
 0x400   :  { %v3873_v19 = vpop.f32.mrf.mxu1  ;;  %v4225_v63 = vmul.f32 %v5320_v52, %v3949_v35  ;;  %5339 = vrcp.f32 %v2332_v9  ;;  %v2290_v35 = vpop.xlane.xlu1 %2289 }
 0x401   :  { %v4224_v60 = vmul.f32 %v5314_v57, %v3873_v19  ;;  %v5213_v61 = vpop.f32.mrf.mxu0 }
 0x402   :  { %v5208_v4 = vpop.f32.mrf.mxu1 }
 0x403   :  { %4267 = vrot.lane.b32.xlu0 %v4224_v60, %s5398_s18  ;;  %v2335_v44 = vpop.xlane.xlu0 %2334 }
 0x404   :  { %v4025_v6 = vpop.f32.mrf.mxu1  ;;  %v4101_v34 = vpop.f32.mrf.mxu0  ;;  %5341 = vrcp.f32 %v2335_v44 }
 0x405   :  { %v4226_v36 = vmul.f32 %v5316_v3, %v4025_v6  ;;  %v4227_v45 = vmul.f32 %v5318_v58, %v4101_v34  ;;  %v5332_v19 = vpop.eup %5331 }
 0x406   :  { %v5218_v11 = vpop.f32.mrf.mxu1  ;;  %v5223_v37 = vpop.f32.mrf.mxu0  ;;  %v4218_v60 = vmul.f32 %v5332_v19, %v6216_v33 }
 0x407   :  { %4273 = vrot.lane.b32.xlu0 %v4227_v45, %s5398_s18  ;;  %4271 = vrot.lane.b32.xlu1 %v4226_v36, %s5398_s18  ;;  %v2338_v43 = vpop.xlane.xlu0 %2337  ;;  %v5334_v58 = vpop.eup %5333 }
 0x408   :  { %v4177_v7 = vpop.f32.mrf.mxu1  ;;  %5343 = vrcp.f32 %v2338_v43  ;;  %v4217_v6 = vmul.f32 %v5334_v58, %v6210_v28 }
 0x409   :  { %v4228_v21 = vmul.f32 %v5322_v22, %v4177_v7 }
 0x40a   :  { %v5228_v20 = vpop.f32.mrf.mxu1  ;;  %v5336_v36 = vpop.eup %5335 }
 0x40b   :  { %4269 = vrot.lane.b32.xlu1 %v4225_v63, %s5398_s18  ;;  %v2287_v47 = vpop.xlane.xlu0 %2286  ;;  %v5338_v11 = vpop.eup %5337  ;;  %v4216_v37 = vmul.f32 %v5336_v36, %v6212_v48 }
 0x40c   :  { %v4219_v33 = vmul.f32 %v5338_v11, %v6214_v0  ;;  %5345 = vrcp.f32 %v2287_v47 }
 0x40d   :  { %v5340_v7 = vpop.eup %5339  ;;  %5347 = vrcp.f32 %v2290_v35 }
 0x40e   :  { %v4220_v28 = vmul.f32 %v5340_v7, %v6220_v46 }
 0x40f   :  { %4275 = vrot.lane.b32.xlu1 %v4228_v21, %s5398_s18  ;;  %v2293_v50 = vpop.xlane.xlu0 %2292 }
 0x410   :  { %5349 = vrcp.f32 %v2293_v50 }
 0x411   :  { %v5342_v20 = vpop.eup %5341 }
 0x412   :  { %v4221_v21 = vmul.f32 %v5342_v20, %v6218_v62 }
 0x413   :  { %v2296_v57 = vpop.xlane.xlu0 %2295 }
 0x415   :  { %v5344_v14 = vpop.eup %5343 }
 0x419   :  { %v5346_v27 = vpop.eup %5345 }
 0x426   :  { %2301 = vadd.xlane.f32.xlu0 %v2300_v12  ;;  %v4222_v12 = vmul.f32 %v5344_v14, %v6222_v56  ;;  %v4205_v56 = vmul.f32 %v5346_v27, %v6188_v10  ;;  %v5385_v27 = vld [vmem:[%s6513_s1 + $0x20] sm:$0xff] }
 0x433   :  { %2298 = vadd.xlane.f32.xlu1 %v2297_v23 }
 0x43c   :  { %4237 = vrot.lane.b32.xlu0 %v4212_v49, %s5398_s18 }
 0x440   :  { %4239 = vrot.lane.b32.xlu0 %v4213_v55, %s5398_s18  ;;  %v5348_v55 = vpop.eup %5347 }
 0x441   :  { %v5350_v18 = vpop.eup %5349 }
 0x444   :  { %4243 = vrot.lane.b32.xlu0 %v4215_v39, %s5398_s18  ;;  %4235 = vrot.lane.b32.xlu1 %v6200_v59, %s5398_s18  ;;  %v4323_v59 = vld [vmem:[%s6515_s4 + $0x20] sm:$0xff]  ;;  %v4206_v39 = vmul.f32 %v5348_v55, %v6190_v42 }
 0x445   :  { %5235 = vmatprep.subr.mxu0 %v4323_v59 }
 0x446   :  { %5236 = vmatpush3.msra.mxu0 %v4323_v59  ;;  %v4207_v59 = vmul.f32 %v5350_v18, %v6194_v38 }
 0x447   :  { %5237 = vmatprep.subr.mxu0 %v4322_v29 }
 0x448   :  { %4241 = vrot.lane.b32.xlu1 %v4214_v25, %s5398_s18  ;;  %5238 = vmatpush3.msra.mxu0 %v4322_v29 }
 0x449   :  { %5239 = vmatprep.subr.mxu0 %v4321_v16 }
 0x44a   :  { %5240 = vmatpush3.msra.mxu0 %v4321_v16 }
 0x44b   :  { %5241 = vmatprep.subr.mxu0 %v4320_v51 }
 0x44c   :  { %5242 = vmatpush3.msra.mxu0 %v4320_v51 }
 0x44d   :  { %5243 = vmatprep.subr.mxu0 %v4319_v53 }
 0x44e   :  { %5244 = vmatpush3.msra.mxu0 %v4319_v53 }
 0x46f   :  { %v4266_v61 = vpop.permute.xlu1 %4265 }
 0x470   :  { %v4283_v45 = vsel %vm317_vm2, %v4217_v6, %v4266_v61 }
 0x475   :  { %v4268_v4 = vpop.permute.xlu0 %4267 }
 0x476   :  { %v4284_v3 = vsel %vm317_vm2, %v4218_v60, %v4268_v4  ;;  %v4816_v60 = vld [vmem:[%s6516_s5] ss:$0 sm:$0xff] }
 0x477   :  { %4297 = vrot.lane.b32.xlu1 %v4284_v3, %s5399_s12 }
 0x479   :  { %v4272_v34 = vpop.permute.xlu1 %4271  ;;  %v4274_v22 = vpop.permute.xlu0 %4273 }
 0x47a   :  { %v4286_v54 = vsel %vm317_vm2, %v4220_v28, %v4272_v34  ;;  %v4287_v0 = vsel %vm317_vm2, %v4221_v21, %v4274_v22  ;;  %v5382_v34 = vld [vmem:[%s6513_s1] sm:$0xff]  ;;  %v5383_v28 = vld [vmem:[%s6513_s1 + $0x18] sm:$0xff] }
 0x47b   :  { %4295 = vrot.lane.b32.xlu1 %v4283_v45, %s5399_s12 }
 0x47d   :  { %v4270_v52 = vpop.permute.xlu1 %4269 }
 0x47e   :  { %v4285_v63 = vsel %vm317_vm2, %v4219_v33, %v4270_v52 }
 0x47f   :  { %4299 = vrot.lane.b32.xlu0 %v4285_v63, %s5399_s12  ;;  %4245 = vrot.lane.b32.xlu1 %v4216_v37, %s5398_s18 }
 0x481   :  { %v4276_v48 = vpop.permute.xlu1 %4275 }
 0x482   :  { %v4288_v15 = vsel %vm317_vm2, %v4222_v12, %v4276_v48 }
 0x483   :  { %4301 = vrot.lane.b32.xlu1 %v4286_v54, %s5399_s12  ;;  %4303 = vrot.lane.b32.xlu0 %v4287_v0, %s5399_s12  ;;  %v5384_v0 = vld [vmem:[%s6513_s1 + $0x10] sm:$0xff] }
 0x487   :  { %4305 = vrot.lane.b32.xlu1 %v4288_v15, %s5399_s12 }
 0x4af   :  { %v2302_v46 = vpop.xlane.xlu0 %2301 }
 0x4b3   :  { %v4238_v23 = vpop.permute.xlu0 %4237 }
 0x4b4   :  { %v4254_v40 = vsel %vm317_vm2, %v4206_v39, %v4238_v23  ;;  %v5386_v39 = vld [vmem:[%s6513_s1 + $0x28] sm:$0xff] }
 0x4b7   :  { %v4240_v49 = vpop.permute.xlu0 %4239 }
 0x4b8   :  { %v4255_v42 = vsel %vm317_vm2, %v4207_v59, %v4240_v49 }
 0x4bb   :  { %v4244_v1 = vpop.permute.xlu0 %4243 }
 0x4bc   :  { %v2299_v32 = vpop.xlane.xlu1 %2298 }
 0x4bd   :  { %5351 = vrcp.f32 %v2299_v32 }
 0x4be   :  { %5353 = vrcp.f32 %v2296_v57 }
 0x4bf   :  { %5355 = vrcp.f32 %v2302_v46 }
 0x4c0   :  { %v4236_v62 = vpop.permute.xlu1 %4235 }
 0x4c1   :  { %v4253_v25 = vsel %vm317_vm2, %v4205_v56, %v4236_v62 }
 0x4c4   :  { %v4242_v26 = vpop.permute.xlu1 %4241 }
 0x4ca   :  { %v5352_v31 = vpop.eup %5351 }
 0x4cb   :  { %v5354_v10 = vpop.eup %5353  ;;  %v4209_v44 = vmul.f32 %v5352_v31, %v6196_v2 }
 0x4cc   :  { %v4208_v47 = vmul.f32 %v5354_v10, %v6192_v13  ;;  %v5356_v38 = vpop.eup %5355 }
 0x4cd   :  { %v4257_v51 = vsel %vm317_vm2, %v4209_v44, %v4244_v1  ;;  %v4210_v57 = vmul.f32 %v5356_v38, %v6198_v24  ;;  %v5381_v24 = vld [vmem:[%s6513_s1 + $0x8] sm:$0xff] }
 0x4ce   :  { %v4256_v8 = vsel %vm317_vm2, %v4208_v47, %v4242_v26 }
 0x4e9   :  { %v4298_v30 = vpop.permute.xlu1 %4297 }
 0x4ea   :  { %v4314_v29 = vsel %vm52_vm0, %v4254_v40, %v4298_v30 }
 0x4ed   :  { %v4296_v17 = vpop.permute.xlu1 %4295 }
 0x4ee   :  { %v4313_v5 = vsel %vm52_vm0, %v4253_v25, %v4296_v17  ;;  %v5387_v17 = vld [vmem:[%s6512_s0] sm:$0xff] }
 0x4ef   :  { %5245 = vmatprep.mubr.msk.f32.mxu0 %vm4334_vm4, %v4313_v5 }
 0x4f0   :  { %5246 = vmatmul.mubr.msk.f32.vlgmr.msra.gmra.mxu0 %vm4334_vm4, %v4314_v29 }
 0x4f1   :  { %v4246_v41 = vpop.permute.xlu1 %4245  ;;  %v4300_v9 = vpop.permute.xlu0 %4299 }
 0x4f2   :  { %v4315_v43 = vsel %vm52_vm0, %v4255_v42, %v4300_v9  ;;  %v4258_v13 = vsel %vm317_vm2, %v4210_v57, %v4246_v41  ;;  %v5388_v41 = vld [vmem:[%s6512_s0 + $0x8] sm:$0xff] }
 0x4f3   :  { %5248 = vmatprep.mubr.msk.f32.mxu0 %vm4334_vm4, %v4315_v43 }
 0x4f5   :  { %v4302_v16 = vpop.permute.xlu1 %4301  ;;  %v4304_v50 = vpop.permute.xlu0 %4303 }
 0x4f6   :  { %v4316_v53 = vsel %vm52_vm0, %v4256_v8, %v4302_v16  ;;  %v4317_v35 = vsel %vm52_vm0, %v4257_v51, %v4304_v50 }
 0x4f7   :  { %5249 = vmatmul.mubr.msk.f32.gmra.mxu0 %vm4334_vm4, %v4316_v53 }
 0x4f8   :  { %5251 = vmatprep.mubr.msk.f32.mxu0 %vm4334_vm4, %v4317_v35  ;;  %v5389_v35 = vld [vmem:[%s6512_s0 + $0x18] sm:$0xff] }
 0x4f9   :  { %v4306_v2 = vpop.permute.xlu1 %4305 }
 0x4fa   :  { %v4318_v19 = vsel %vm52_vm0, %v4258_v13, %v4306_v2  ;;  %v5390_v2 = vld [vmem:[%s6512_s0 + $0x10] sm:$0xff] }
 0x4fb   :  { %5252 = vmatmul.mubr.msk.f32.gmra.mxu0 %vm4334_vm4, %v4318_v19 }
 0x5b0   :  { %v5247_v61 = vpop.f32.mrf.mxu0 }
 0x5b1   :  { %v4425_v4 = vadd.f32 %v5247_v61, %v4816_v60 }
 0x5b2   :  { %v4419_v3 = vpop.f32.mrf.mxu0 }
 0x5b3   :  { %v4420_v58 = vadd.f32 %v4816_v60, %v4419_v3  ;;  %4456 = vrot.lane.b32.xlu1 %v4425_v4, %s5396_s3  ;;  %v6320_v6 = vadd.f32 %v5381_v24, %v4425_v4 }
 0x5b5   :  { %4454 = vrot.lane.b32.xlu0 %v4420_v58, %s5396_s3  ;;  %v6325_v36 = vadd.f32 %v5382_v34, %v4420_v58  ;;  %v4600_v11 = vmul.f32 %v6320_v6, %v6320_v6  ;;  %v4578_v33 = vsel %vm52_vm0, %v6320_v6, 0.0 }
 0x5b7   :  { %v4575_v45 = vsel %vm52_vm0, %v6325_v36, 0.0  ;;  %v4608_v37 = vsel %vm52_vm0, %v4600_v11, 0.0  ;;  %v5250_v52 = vpop.f32.mrf.mxu0  ;;  %v4599_v22 = vmul.f32 %v6325_v36, %v6325_v36 }
 0x5b8   :  { %v4435_v7 = vadd.f32 %v5250_v52, %v4816_v60 }
 0x5b9   :  { %v4429_v63 = vpop.f32.mrf.mxu0  ;;  %v4605_v54 = vsel %vm52_vm0, %v4599_v22, 0.0 }
 0x5ba   :  { %v4430_v20 = vadd.f32 %v4816_v60, %v4429_v63  ;;  %v6341_v21 = vadd.f32 %v5383_v28, %v4435_v7 }
 0x5bb   :  { %v5253_v46 = vpop.f32.mrf.mxu0 }
 0x5bc   :  { %v6347_v14 = vadd.f32 %v5384_v0, %v4430_v20  ;;  %v4584_v48 = vsel %vm52_vm0, %v6341_v21, 0.0  ;;  %v4602_v15 = vmul.f32 %v6341_v21, %v6341_v21  ;;  %v4445_v62 = vadd.f32 %v5253_v46, %v4816_v60 }
 0x5bd   :  { %v4439_v23 = vpop.f32.mrf.mxu0 }
 0x5be   :  { %v4581_v12 = vsel %vm52_vm0, %v6347_v14, 0.0  ;;  %v4614_v32 = vsel %vm52_vm0, %v4602_v15, 0.0  ;;  %v4440_v26 = vadd.f32 %v4816_v60, %v4439_v23  ;;  %v4601_v49 = vmul.f32 %v6347_v14, %v6347_v14 }
 0x5bf   :  { %v6373_v1 = vadd.f32 %v5386_v39, %v4445_v62 }
 0x5c0   :  { %v6363_v55 = vadd.f32 %v5385_v27, %v4440_v26  ;;  %v4611_v30 = vsel %vm52_vm0, %v4601_v49, 0.0 }
 0x5c1   :  { %v4590_v5 = vsel %vm52_vm0, %v6373_v1, 0.0  ;;  %v4604_v59 = vmul.f32 %v6373_v1, %v6373_v1 }
 0x5c2   :  { %v4587_v56 = vsel %vm52_vm0, %v6363_v55, 0.0  ;;  %v4603_v18 = vmul.f32 %v6363_v55, %v6363_v55 }
 0x5c3   :  { %v4620_v44 = vsel %vm52_vm0, %v4604_v59, 0.0 }
 0x5c4   :  { %v4617_v40 = vsel %vm52_vm0, %v4603_v18, 0.0 }
 0x5d4   :  { %4576 = vadd.xlane.f32.xlu0 %v4575_v45 }
 0x5d7   :  { %4579 = vadd.xlane.f32.xlu1 %v4578_v33 }
 0x5d8   :  { %4609 = vadd.xlane.f32.xlu0 %v4608_v37 }
 0x5e8   :  { %4460 = vrot.lane.b32.xlu1 %v4435_v7, %s5396_s3  ;;  %v5391_v7 = vld [vmem:[%s6512_s0 + $0x28] sm:$0xff] }
 0x5ee   :  { %4458 = vrot.lane.b32.xlu0 %v4430_v20, %s5396_s3 }
 0x60c   :  { %4606 = vadd.xlane.f32.xlu1 %v4605_v54 }
 0x60d   :  { %4585 = vadd.xlane.f32.xlu0 %v4584_v48 }
 0x611   :  { %4582 = vadd.xlane.f32.xlu0 %v4581_v12 }
 0x615   :  { %4615 = vadd.xlane.f32.xlu0 %v4614_v32 }
 0x61d   :  { %4464 = vrot.lane.b32.xlu1 %v4445_v62, %s5396_s3 }
 0x625   :  { %v4457_v29 = vpop.permute.xlu1 %4456 }
 0x626   :  { %v6392_v9 = vadd.f32 %v5388_v41, %v4457_v29 }
 0x627   :  { %v4455_v25 = vpop.permute.xlu0 %4454 }
 0x628   :  { %v6378_v31 = vadd.f32 %v5387_v17, %v4455_v25  ;;  %v4481_v47 = vsel %vm52_vm0, %v6392_v9, 0.0  ;;  %v4504_v38 = vmul.f32 %v6392_v9, %v6392_v9 }
 0x62a   :  { %v4478_v10 = vsel %vm52_vm0, %v6378_v31, 0.0  ;;  %v4503_v42 = vmul.f32 %v6378_v31, %v6378_v31  ;;  %v4512_v8 = vsel %vm52_vm0, %v4504_v38, 0.0 }
 0x62b   :  { %4462 = vrot.lane.b32.xlu0 %v4440_v26, %s5396_s3 }
 0x62c   :  { %v4509_v43 = vsel %vm52_vm0, %v4503_v42, 0.0 }
 0x641   :  { %4612 = vadd.xlane.f32.xlu1 %v4611_v30  ;;  %v5392_v30 = vld [vmem:[%s6512_s0 + $0x20] sm:$0xff] }
 0x645   :  { %4588 = vadd.xlane.f32.xlu1 %v4587_v56 }
 0x649   :  { %4618 = vadd.xlane.f32.xlu1 %v4617_v40 }
 0x64a   :  { %4591 = vadd.xlane.f32.xlu0 %v4590_v5 }
 0x64d   :  { %4479 = vadd.xlane.f32.xlu1 %v4478_v10 }
 0x64e   :  { %4621 = vadd.xlane.f32.xlu0 %v4620_v44 }
 0x651   :  { %4510 = vadd.xlane.f32.xlu1 %v4509_v43 }
 0x652   :  { %4482 = vadd.xlane.f32.xlu0 %v4481_v47 }
 0x656   :  { %4513 = vadd.xlane.f32.xlu0 %v4512_v8 }
 0x65d   :  { %v4577_v16 = vpop.xlane.xlu0 %4576 }
 0x65e   :  { %v4593_v22 = vmul.f32 0.03125, %v4577_v16 }
 0x660   :  { %v4580_v51 = vpop.xlane.xlu1 %4579  ;;  %v4635_v15 = vmul.f32 %v4593_v22, %v4593_v22  ;;  %v4629_v41 = vsub.f32 %v6325_v36, %v4593_v22 }
 0x661   :  { %v4610_v50 = vpop.xlane.xlu0 %4609  ;;  %v4594_v34 = vmul.f32 0.03125, %v4580_v51 }
 0x662   :  { %v4624_v37 = vmul.f32 0.03125, %v4610_v50 }
 0x663   :  { %v4636_v33 = vmul.f32 %v4594_v34, %v4594_v34  ;;  %v4630_v29 = vsub.f32 %v6320_v6, %v4594_v34 }
 0x664   :  { %v4461_v53 = vpop.permute.xlu1 %4460 }
 0x665   :  { %v6404_v57 = vadd.f32 %v5389_v35, %v4461_v53  ;;  %v4459_v13 = vpop.permute.xlu0 %4458  ;;  %v4642_v28 = vsub.f32 %v4624_v37, %v4636_v33 }
 0x666   :  { %v6409_v19 = vadd.f32 %v5390_v2, %v4459_v13 }
 0x667   :  { %v4487_v60 = vsel %vm52_vm0, %v6404_v57, 0.0  ;;  %v4506_v61 = vmul.f32 %v6404_v57, %v6404_v57  ;;  %v4648_v46 = vadd.f32 1e-05, %v4642_v28 }
 0x668   :  { %4488 = vadd.xlane.f32.xlu0 %v4487_v60  ;;  %v4484_v4 = vsel %vm52_vm0, %v6409_v19, 0.0  ;;  %v4505_v3 = vmul.f32 %v6409_v19, %v6409_v19 }
 0x669   :  { %4485 = vadd.xlane.f32.xlu1 %v4484_v4  ;;  %v4518_v58 = vsel %vm52_vm0, %v4506_v61, 0.0  ;;  %5357 = vrsqrt.f32 %v4648_v46 }
 0x66a   :  { %v4515_v24 = vsel %vm52_vm0, %v4505_v3, 0.0 }
 0x66c   :  { %4519 = vadd.xlane.f32.xlu0 %v4518_v58 }
 0x66d   :  { %4516 = vadd.xlane.f32.xlu1 %v4515_v24 }
 0x676   :  { %v5358_v59 = vpop.eup %5357 }
 0x677   :  { %v4660_v10 = vmul.f32 %v5358_v59, %v4630_v29 }
 0x695   :  { %v4607_v45 = vpop.xlane.xlu1 %4606 }
 0x696   :  { %v4586_v11 = vpop.xlane.xlu0 %4585  ;;  %v4623_v48 = vmul.f32 0.03125, %v4607_v45 }
 0x697   :  { %v4596_v32 = vmul.f32 0.03125, %v4586_v11 }
 0x698   :  { %v4641_v23 = vsub.f32 %v4623_v48, %v4635_v15 }
 0x699   :  { %v4465_v52 = vpop.permute.xlu1 %4464  ;;  %v4638_v27 = vmul.f32 %v4596_v32, %v4596_v32  ;;  %v4632_v47 = vsub.f32 %v6341_v21, %v4596_v32 }
 0x69a   :  { %v6424_v63 = vadd.f32 %v5391_v7, %v4465_v52  ;;  %v4583_v20 = vpop.xlane.xlu0 %4582  ;;  %v4647_v18 = vadd.f32 1e-05, %v4641_v23 }
 0x69b   :  { %v4595_v8 = vmul.f32 0.03125, %v4583_v20 }
 0x69c   :  { %v4493_v54 = vsel %vm52_vm0, %v6424_v63, 0.0  ;;  %v4508_v0 = vmul.f32 %v6424_v63, %v6424_v63  ;;  %5359 = vrsqrt.f32 %v4647_v18 }
 0x69d   :  { %4494 = vadd.xlane.f32.xlu0 %v4493_v54  ;;  %v4637_v51 = vmul.f32 %v4595_v8, %v4595_v8  ;;  %v4631_v33 = vsub.f32 %v6347_v14, %v4595_v8 }
 0x69e   :  { %v4616_v12 = vpop.xlane.xlu0 %4615  ;;  %v4524_v62 = vsel %vm52_vm0, %v4508_v0, 0.0 }
 0x69f   :  { %v4626_v26 = vmul.f32 0.03125, %v4616_v12 }
 0x6a1   :  { %4525 = vadd.xlane.f32.xlu0 %v4524_v62  ;;  %v4644_v39 = vsub.f32 %v4626_v26, %v4638_v27 }
 0x6a2   :  { %v4463_v49 = vpop.permute.xlu0 %4462 }
 0x6a3   :  { %v6434_v56 = vadd.f32 %v5392_v30, %v4463_v49  ;;  %v4650_v40 = vadd.f32 1e-05, %v4644_v39 }
 0x6a5   :  { %v4490_v25 = vsel %vm52_vm0, %v6434_v56, 0.0  ;;  %v4507_v17 = vmul.f32 %v6434_v56, %v6434_v56  ;;  %5361 = vrsqrt.f32 %v4650_v40 }
 0x6a6   :  { %4491 = vadd.xlane.f32.xlu1 %v4490_v25 }
 0x6a7   :  { %v4521_v5 = vsel %vm52_vm0, %v4507_v17, 0.0 }
 0x6a9   :  { %v5360_v42 = vpop.eup %5359 }
 0x6aa   :  { %4522 = vadd.xlane.f32.xlu1 %v4521_v5  ;;  %v4659_v44 = vmul.f32 %v5360_v42, %v4629_v41 }
 0x6b2   :  { %v5362_v43 = vpop.eup %5361 }
 0x6b3   :  { %v4662_v38 = vmul.f32 %v5362_v43, %v4632_v47 }
 0x6b7   :  { %4673 = vrot.lane.b32.xlu0 %v4660_v10, %s5399_s12 }
 0x6bb   :  { %4671 = vrot.lane.b32.xlu1 %v4659_v44, %s5399_s12 }
 0x6bf   :  { %4677 = vrot.lane.b32.xlu1 %v4662_v38, %s5399_s12  ;;  %v6457_v38 = vld [vmem:[%s6517_s6] ss:$0 sm:$0xff] }
 0x6ca   :  { %v4613_v16 = vpop.xlane.xlu1 %4612 }
 0x6cb   :  { %v4625_v50 = vmul.f32 0.03125, %v4613_v16  ;;  %v6462_v16 = vld [vmem:[%s6518_s7] ss:$0 sm:$0xff] }
 0x6cd   :  { %v4643_v6 = vsub.f32 %v4625_v50, %v4637_v51 }
 0x6ce   :  { %v4589_v53 = vpop.xlane.xlu1 %4588 }
 0x6cf   :  { %v4649_v35 = vadd.f32 1e-05, %v4643_v6  ;;  %v4597_v13 = vmul.f32 0.03125, %v4589_v53 }
 0x6d1   :  { %5363 = vrsqrt.f32 %v4649_v35  ;;  %v4639_v2 = vmul.f32 %v4597_v13, %v4597_v13  ;;  %v4633_v7 = vsub.f32 %v6363_v55, %v4597_v13 }
 0x6d2   :  { %v4619_v36 = vpop.xlane.xlu1 %4618 }
 0x6d3   :  { %v4627_v60 = vmul.f32 0.03125, %v4619_v36  ;;  %v4592_v61 = vpop.xlane.xlu0 %4591 }
 0x6d4   :  { %v4598_v4 = vmul.f32 0.03125, %v4592_v61 }
 0x6d5   :  { %v4645_v21 = vsub.f32 %v4627_v60, %v4639_v2 }
 0x6d6   :  { %v4640_v24 = vmul.f32 %v4598_v4, %v4598_v4  ;;  %v4634_v28 = vsub.f32 %v6373_v1, %v4598_v4  ;;  %v4480_v15 = vpop.xlane.xlu1 %4479 }
 0x6d7   :  { %v4651_v3 = vadd.f32 1e-05, %v4645_v21  ;;  %v4622_v58 = vpop.xlane.xlu0 %4621  ;;  %v4497_v55 = vmul.f32 0.03125, %v4480_v15 }
 0x6d8   :  { %v4628_v34 = vmul.f32 0.03125, %v4622_v58 }
 0x6d9   :  { %5365 = vrsqrt.f32 %v4651_v3  ;;  %v4539_v18 = vmul.f32 %v4497_v55, %v4497_v55  ;;  %v4533_v13 = vsub.f32 %v6378_v31, %v4497_v55 }
 0x6da   :  { %v4646_v45 = vsub.f32 %v4628_v34, %v4640_v24  ;;  %v4511_v26 = vpop.xlane.xlu1 %4510 }
 0x6db   :  { %v4483_v48 = vpop.xlane.xlu0 %4482  ;;  %v4527_v27 = vmul.f32 0.03125, %v4511_v26 }
 0x6dc   :  { %v4652_v11 = vadd.f32 1e-05, %v4646_v45  ;;  %v4498_v14 = vmul.f32 0.03125, %v4483_v48 }
 0x6dd   :  { %v4545_v1 = vsub.f32 %v4527_v27, %v4539_v18 }
 0x6de   :  { %v5364_v37 = vpop.eup %5363  ;;  %5367 = vrsqrt.f32 %v4652_v11  ;;  %v4540_v46 = vmul.f32 %v4498_v14, %v4498_v14  ;;  %v4534_v44 = vsub.f32 %v6392_v9, %v4498_v14 }
 0x6df   :  { %v4661_v52 = vmul.f32 %v5364_v37, %v4631_v33  ;;  %v4514_v12 = vpop.xlane.xlu0 %4513  ;;  %v4551_v40 = vadd.f32 1e-05, %v4545_v1 }
 0x6e0   :  { %v4528_v32 = vmul.f32 0.03125, %v4514_v12 }
 0x6e1   :  { %4675 = vrot.lane.b32.xlu1 %v4661_v52, %s5399_s12 }
 0x6e2   :  { %v4546_v62 = vsub.f32 %v4528_v32, %v4540_v46 }
 0x6e4   :  { %v4552_v49 = vadd.f32 1e-05, %v4546_v62 }
 0x6e6   :  { %v5366_v20 = vpop.eup %5365  ;;  %5369 = vrsqrt.f32 %v4552_v49 }
 0x6e7   :  { %v4663_v22 = vmul.f32 %v5366_v20, %v4633_v7  ;;  %5371 = vrsqrt.f32 %v4551_v40 }
 0x6e9   :  { %4679 = vrot.lane.b32.xlu0 %v4663_v22, %s5399_s12 }
 0x6eb   :  { %v5368_v54 = vpop.eup %5367 }
 0x6ec   :  { %v4664_v0 = vmul.f32 %v5368_v54, %v4634_v28 }
 0x6ee   :  { %4681 = vrot.lane.b32.xlu1 %v4664_v0, %s5399_s12 }
 0x6f1   :  { %v4489_v23 = vpop.xlane.xlu0 %4488 }
 0x6f2   :  { %v4500_v39 = vmul.f32 0.03125, %v4489_v23  ;;  %v4486_v59 = vpop.xlane.xlu1 %4485 }
 0x6f3   :  { %v5370_v42 = vpop.eup %5369  ;;  %v4499_v36 = vmul.f32 0.03125, %v4486_v59 }
 0x6f4   :  { %v4542_v17 = vmul.f32 %v4500_v39, %v4500_v39  ;;  %v4564_v47 = vmul.f32 %v5370_v42, %v4534_v44  ;;  %v5372_v53 = vpop.eup %5371  ;;  %v4536_v21 = vsub.f32 %v6404_v57, %v4500_v39 }
 0x6f5   :  { %v4520_v30 = vpop.xlane.xlu0 %4519  ;;  %v4563_v60 = vmul.f32 %v5372_v53, %v4533_v13  ;;  %v4541_v3 = vmul.f32 %v4499_v36, %v4499_v36  ;;  %v4535_v46 = vsub.f32 %v6409_v19, %v4499_v36 }
 0x6f6   :  { %v4530_v25 = vmul.f32 0.03125, %v4520_v30  ;;  %v4517_v43 = vpop.xlane.xlu1 %4516 }
 0x6f7   :  { %v4529_v2 = vmul.f32 0.03125, %v4517_v43 }
 0x6f8   :  { %v4548_v5 = vsub.f32 %v4530_v25, %v4542_v17 }
 0x6f9   :  { %v4547_v34 = vsub.f32 %v4529_v2, %v4541_v3 }
 0x6fa   :  { %v4554_v29 = vadd.f32 1e-05, %v4548_v5 }
 0x6fb   :  { %v4553_v52 = vadd.f32 1e-05, %v4547_v34 }
 0x6fc   :  { %5373 = vrsqrt.f32 %v4554_v29 }
 0x6fd   :  { %5375 = vrsqrt.f32 %v4553_v52 }
 0x709   :  { %v5374_v61 = vpop.eup %5373 }
 0x70a   :  { %v4566_v45 = vmul.f32 %v5374_v61, %v4536_v21  ;;  %v5376_v32 = vpop.eup %5375 }
 0x70b   :  { %v4565_v62 = vmul.f32 %v5376_v32, %v4535_v46 }
 0x726   :  { %v4495_v10 = vpop.xlane.xlu0 %4494 }
 0x727   :  { %v4502_v28 = vmul.f32 0.03125, %v4495_v10 }
 0x729   :  { %v4544_v48 = vmul.f32 %v4502_v28, %v4502_v28  ;;  %v4538_v25 = vsub.f32 %v6424_v63, %v4502_v28 }
 0x72a   :  { %v4526_v41 = vpop.xlane.xlu0 %4525 }
 0x72b   :  { %v4532_v0 = vmul.f32 0.03125, %v4526_v41 }
 0x72d   :  { %v4550_v14 = vsub.f32 %v4532_v0, %v4544_v48 }
 0x72e   :  { %v4674_v8 = vpop.permute.xlu0 %4673 }
 0x72f   :  { %v4690_v51 = vsel %vm52_vm0, %v4564_v47, %v4674_v8  ;;  %v4492_v50 = vpop.xlane.xlu1 %4491  ;;  %v4556_v15 = vadd.f32 1e-05, %v4550_v14 }
 0x730   :  { %v4703_v6 = vmul.f32 %v6457_v38, %v4690_v51  ;;  %v4501_v33 = vmul.f32 0.03125, %v4492_v50 }
 0x732   :  { %v4716_v9 = vadd.f32 %v6462_v16, %v4703_v6  ;;  %v4543_v22 = vmul.f32 %v4501_v33, %v4501_v33  ;;  %v4537_v30 = vsub.f32 %v6434_v56, %v4501_v33 }
 0x733   :  { %v4523_v35 = vpop.xlane.xlu1 %4522 }
 0x734   :  { %4722 = vst.msk [vmem:[%s6519_s8 + $0x8] sm:$0xff] %vm4334_vm4, %v4716_v9  ;;  %v4531_v7 = vmul.f32 0.03125, %v4523_v35 }
 0x736   :  { %v4549_v54 = vsub.f32 %v4531_v7, %v4543_v22 }
 0x737   :  { %v4672_v4 = vpop.permute.xlu1 %4671 }
 0x738   :  { %v4689_v58 = vsel %vm52_vm0, %v4563_v60, %v4672_v4  ;;  %v4555_v12 = vadd.f32 1e-05, %v4549_v54 }
 0x739   :  { %v4702_v24 = vmul.f32 %v6457_v38, %v4689_v58 }
 0x73a   :  { %5377 = vrsqrt.f32 %v4555_v12 }
 0x73b   :  { %v4715_v31 = vadd.f32 %v6462_v16, %v4702_v24  ;;  %v4678_v11 = vpop.permute.xlu1 %4677  ;;  %5379 = vrsqrt.f32 %v4556_v15 }
 0x73c   :  { %v4692_v37 = vsel %vm52_vm0, %v4566_v45, %v4678_v11 }
 0x73d   :  { %4721 = vst.msk [vmem:[%s6519_s8] sm:$0xff] %vm4334_vm4, %v4715_v31  ;;  %v4705_v57 = vmul.f32 %v6457_v38, %v4692_v37 }
 0x73f   :  { %v4718_v20 = vadd.f32 %v6462_v16, %v4705_v57 }
 0x741   :  { %4724 = vst.msk [vmem:[%s6519_s8 + $0x18] sm:$0xff] %vm4334_vm4, %v4718_v20 }
 0x747   :  { %v5378_v49 = vpop.eup %5377 }
 0x748   :  { %v4567_v18 = vmul.f32 %v5378_v49, %v4537_v30  ;;  %v5380_v1 = vpop.eup %5379 }
 0x749   :  { %v4568_v5 = vmul.f32 %v5380_v1, %v4538_v25 }
 0x753   :  { %v4676_v23 = vpop.permute.xlu1 %4675 }
 0x754   :  { %v4691_v26 = vsel %vm52_vm0, %v4565_v62, %v4676_v23 }
 0x755   :  { %v4704_v55 = vmul.f32 %v6457_v38, %v4691_v26 }
 0x757   :  { %v4717_v27 = vadd.f32 %v6462_v16, %v4704_v55 }
 0x759   :  { %4723 = vst.msk [vmem:[%s6519_s8 + $0x10] sm:$0xff] %vm4334_vm4, %v4717_v27 }
 0x75b   :  { %v4680_v39 = vpop.permute.xlu0 %4679 }
 0x75c   :  { %v4693_v19 = vsel %vm52_vm0, %v4567_v18, %v4680_v39 }
 0x75d   :  { %v4706_v17 = vmul.f32 %v6457_v38, %v4693_v19 }
 0x75f   :  { %v4719_v40 = vadd.f32 %v6462_v16, %v4706_v17 }
 0x760   :  { %v4682_v59 = vpop.permute.xlu1 %4681 }
 0x761   :  { %4725 = vst.msk [vmem:[%s6519_s8 + $0x20] sm:$0xff] %vm4334_vm4, %v4719_v40  ;;  %v4694_v56 = vsel %vm52_vm0, %v4568_v5, %v4682_v59 }
 0x762   :  { %v4707_v29 = vmul.f32 %v6457_v38, %v4694_v56 }
 0x764   :  { %v4720_v10 = vadd.f32 %v6462_v16, %v4707_v29 }
 0x766   :  { %4726 = vst.msk [vmem:[%s6519_s8 + $0x28] sm:$0xff] %vm4334_vm4, %v4720_v10 }

</bundles_post_ra>
